<compile_context>
chip_gen: v6e
topology: v6e:2x2x1
jax: 0.10.0
libtpu: 0.0.40
codegen_flags: <defaults>
</compile_context>

<pallas_src>
from functools import partial

import jax
import jax.numpy as jnp
from jax.experimental import pallas as pl
from jax.experimental.pallas import tpu as pltpu


def _conv_bias_relu_kernel(x_ref, w_ref, b_ref, o_ref, *,
                           KH, KW, stride, dilation, Ho, Wo, nchw_out):
    """One batch tile (B images) per grid step.

    x_ref : (B, Hp, Wp, Cin)      padded NHWC input block
    w_ref : (KH*KW, Cin, Cout)    per-tap weight slabs, (kh, kw) major
    b_ref : (1, Cout)             f32 bias (lane-dense, broadcasts over rows)
    o_ref : (B, Cout, Ho*Wo)  if nchw_out  (lane dim = Ho*Wo >= 128)
            (B, Ho*Wo, Cout)  otherwise    (lane dim = Cout)
    """
    B, _, _, Cin = x_ref.shape
    Cout = w_ref.shape[2]
    R = Ho * Wo
    M = B * R

    # KH*KW accumulated dots (no concat, no giant patches temporary).
    acc = None
    for kh in range(KH):
        for kw in range(KW):
            h0 = kh * dilation
            w0 = kw * dilation
            if stride == 1:
                hs = slice(h0, h0 + Ho)
                ws = slice(w0, w0 + Wo)
            else:
                # Stride lives in the ref slice -> only needed rows are loaded.
                hs = pl.ds(h0, Ho, stride=stride)
                ws = pl.ds(w0, Wo, stride=stride)
            if B == 1:
                tap = x_ref[0, hs, ws, :]          # (Ho, Wo, Cin)
            else:
                tap = x_ref[:, hs, ws, :]          # (B, Ho, Wo, Cin)
            part = jnp.dot(tap.reshape(M, Cin), w_ref[kh * KW + kw],
                           preferred_element_type=jnp.float32)   # (M, Cout) f32
            acc = part if acc is None else acc + part

    # Bias + ReLU in f32 on the (M, Cout) orientation (lane-dense bias add,
    # before any transpose).
    acc = jnp.maximum(acc + b_ref[...].astype(jnp.float32), 0.0)

    if nchw_out:
        # Ho*Wo >= 128: per-image transpose so the store is lane-dense AND the
        # HBM output is already channels-first (wrapper reshape is free).
        for b in range(B):
            o_ref[b] = acc[b * R:(b + 1) * R, :].T.astype(o_ref.dtype)
    else:
        # Ho*Wo < 128 (RoI heads): keep Cout (=256 in practice) as the lane
        # dim; NCHW is produced by the wrapper / downstream.
        o_ref[...] = acc.reshape(B, R, Cout).astype(o_ref.dtype)


def cascade_head_conv_module(x, weight_oihw, bias, *,
                             stride=1, padding=0, dilation=1,
                             data_format="NCHW", compute_dtype=None,
                             batch_tile=8):
    """Forward pass of CascadeHeadConvModule (use_gn=False): relu(conv(x)+b).

    x is NCHW (PyTorch default) or NHWC; output is always NCHW.
    compute_dtype=jnp.bfloat16 is recommended on v6e/v7x (f32 accumulation is
    kept inside the kernel).
    """
    # TODO(synk): use_gn=True branch (GroupNorm instead of bias) not implemented.
    if data_format == "NCHW":
        N, Cin, H, W = x.shape
        x_nhwc = jnp.transpose(x, (0, 2, 3, 1))
    else:
        N, H, W, Cin = x.shape
        x_nhwc = x
    Cout, Cin_w, KH, KW = weight_oihw.shape
    assert Cin_w == Cin

    out_dtype = x.dtype
    if compute_dtype is not None:
        x_nhwc = x_nhwc.astype(compute_dtype)
        weight_oihw = weight_oihw.astype(compute_dtype)

    Hp, Wp = H + 2 * padding, W + 2 * padding
    Ho = (Hp - dilation * (KH - 1) - 1) // stride + 1
    Wo = (Wp - dilation * (KW - 1) - 1) // stride + 1
    R = Ho * Wo
    nchw_out = R >= 128   # which store orientation is lane-dense (see kernel)

    # OIHW -> (KH*KW, Cin, Cout): per-tap (Cin, Cout) slabs, (kh, kw) order
    # matching the in-kernel tap loop.
    w2 = jnp.transpose(weight_oihw, (2, 3, 1, 0)).reshape(KH * KW, Cin, Cout)
    b2 = bias.astype(jnp.float32).reshape(1, Cout)     # lane-dense bias block

    in_itemsize = jnp.dtype(x_nhwc.dtype).itemsize
    out_itemsize = jnp.dtype(out_dtype).itemsize
    w_bytes = w2.size * in_itemsize

    # --- batch tile: fill the MXU M dim / amortize grid-step overhead, keep
    # >= ~8 grid steps when N allows, stay inside a conservative VMEM budget.
    def _vmem_est(b):
        in_b = b * Hp * Wp * Cin * in_itemsize          # double-buffered
        out_b = b * R * Cout * out_itemsize             # double-buffered
        acc_b = b * R * Cout * 4                        # f32 accumulator
        return 2 * (in_b + w_bytes + out_b) + acc_b + b2.size * 4

    bt = max(1, min(int(batch_tile), max(1, N // 8), N))
    while bt > 1 and _vmem_est(bt) > (24 << 20):
        bt -= 1

    # Pad batch (to a multiple of bt) and spatial zero-pad in a single copy.
    # TODO(synk): fold the spatial zero-pad into the kernel (guard border taps)
    #             to remove this wrapper-side HBM round trip entirely.
    n_pad = (-N) % bt
    xp = jnp.pad(x_nhwc, ((0, n_pad), (padding, padding),
                          (padding, padding), (0, 0)))
    Np = N + n_pad

    kernel = partial(_conv_bias_relu_kernel, KH=KH, KW=KW, stride=stride,
                     dilation=dilation, Ho=Ho, Wo=Wo, nchw_out=nchw_out)

    if nchw_out:
        out_shape = jax.ShapeDtypeStruct((Np, Cout, R), out_dtype)
        out_spec = pl.BlockSpec((bt, Cout, R), lambda n: (n, 0, 0))
    else:
        out_shape = jax.ShapeDtypeStruct((Np, R, Cout), out_dtype)
        out_spec = pl.BlockSpec((bt, R, Cout), lambda n: (n, 0, 0))

    flops = 2 * Np * R * Cout * KH * KW * Cin + 2 * Np * R * Cout
    bytes_accessed = (xp.size * xp.dtype.itemsize
                      + w2.size * w2.dtype.itemsize
                      + b2.size * b2.dtype.itemsize
                      + Np * R * Cout * out_itemsize)

    # Explicit scoped-VMEM limit (v7x: 64 MiB physical / 32 MiB default).
    vmem_limit = int(max(32 << 20,
                         min(int(2.5 * _vmem_est(bt)) + (4 << 20), 60 << 20)))

    out = pl.pallas_call(
        kernel,
        out_shape=out_shape,
        grid_spec=pltpu.PrefetchScalarGridSpec(
            num_scalar_prefetch=0,
            grid=(Np // bt,),
            in_specs=[
                pl.BlockSpec((bt, Hp, Wp, Cin), lambda n: (n, 0, 0, 0)),
                # Constant index maps -> weights/bias are fetched once.
                pl.BlockSpec((KH * KW, Cin, Cout), lambda n: (0, 0, 0)),
                pl.BlockSpec((1, Cout), lambda n: (0, 0)),
            ],
            out_specs=out_spec,
        ),
        compiler_params=pltpu.CompilerParams(
            dimension_semantics=("parallel",),
            vmem_limit_bytes=vmem_limit),
        cost_estimate=pl.CostEstimate(flops=flops, transcendentals=0,
                                      bytes_accessed=bytes_accessed),
    )(xp, w2, b2)

    if nchw_out:
        # Already channels-first: split the flat spatial dim (free reshape).
        return out[:N].reshape(N, Cout, Ho, Wo)
    # Channels-last store path: one wrapper transpose to NCHW.
    return jnp.transpose(out[:N].reshape(N, Ho, Wo, Cout), (0, 3, 1, 2))


if __name__ == "__main__":
    # Module config: CascadeHeadConvModule(in_channels=4, out_channels=8,
    #                                      kernel_size=3, stride=1, padding=1)
    N, Cin, H, W = 2, 4, 16, 16
    Cout, K = 8, 3
    stride, padding, dilation = 1, 1, 1

    key = jax.random.PRNGKey(0)
    kx, kw, kb = jax.random.split(key, 3)

    x = jax.random.normal(kx, (N, Cin, H, W), dtype=jnp.float32)

    # kaiming_normal_(mode='fan_out', nonlinearity='relu'):
    #   std = sqrt(2 / fan_out), fan_out = Cout * K * K
    fan_out = Cout * K * K
    weight = jax.random.normal(kw, (Cout, Cin, K, K), dtype=jnp.float32) \
        * jnp.sqrt(2.0 / fan_out)

    # PyTorch Conv2d default bias init: U(-1/sqrt(fan_in), 1/sqrt(fan_in))
    fan_in = Cin * K * K
    bound = 1.0 / jnp.sqrt(fan_in)
    bias = jax.random.uniform(kb, (Cout,), dtype=jnp.float32,
                              minval=-bound, maxval=bound)

    # Pure-JAX reference.
    ref = jax.lax.conv_general_dilated(
        x, weight, window_strides=(stride, stride),
        padding=((padding, padding), (padding, padding)),
        rhs_dilation=(dilation, dilation),
        dimension_numbers=("NCHW", "OIHW", "NCHW"))
    ref = jnp.maximum(ref + bias.reshape(1, Cout, 1, 1), 0.0)

    # f32 path (tight tolerance).
    out = cascade_head_conv_module(x, weight, bias, stride=stride,
                                   padding=padding, dilation=dilation)
    out = jax.block_until_ready(out)
    assert out.shape == ref.shape, (out.shape, ref.shape)
    assert jnp.allclose(out, ref, atol=1e-4, rtol=1e-4), \
        float(jnp.max(jnp.abs(out - ref)))

    # bf16 compute path (v6e/v7x MXU; f32 accumulation inside the kernel).
    out_bf16 = cascade_head_conv_module(x, weight, bias, stride=stride,
                                        padding=padding, dilation=dilation,
                                        compute_dtype=jnp.bfloat16)
    out_bf16 = jax.block_until_ready(out_bf16)
    assert jnp.allclose(out_bf16.astype(jnp.float32), ref,
                        atol=5e-2, rtol=5e-2), \
        float(jnp.max(jnp.abs(out_bf16.astype(jnp.float32) - ref)))

    print("KERNEL_OK")
</pallas_src>

<mosaic_0001>
module attributes {stable_mosaic.version = 11 : i64} {
  func.func @_conv_bias_relu_kernel(%arg0: i32, %arg1: memref<1x18x18x4xf32, #tpu.memory_space<vmem>>, %arg2: memref<9x4x8xf32, #tpu.memory_space<vmem>>, %arg3: memref<1x8xf32, #tpu.memory_space<vmem>>, %arg4: memref<1x8x256xf32, #tpu.memory_space<vmem>>) attributes {dimension_semantics = [#tpu.dimension_semantics<parallel>], iteration_bounds = array<i64: 2>, scalar_prefetch = 0 : i64, scratch_operands = 0 : i64, tpu.core_type = #tpu.core_type<tc>, window_params = [{transform_indices = @transform_0, window_bounds = array<i64: 1, 18, 18, 4>}, {pipeline_mode = #tpu.pipeline_mode<synchronous>, transform_indices = @transform_1, window_bounds = array<i64: 9, 4, 8>}, {pipeline_mode = #tpu.pipeline_mode<synchronous>, transform_indices = @transform_2, window_bounds = array<i64: 1, 8>}, {transform_indices = @transform_3, window_bounds = array<i64: 1, 8, 256>}]} {
    %c0 = arith.constant 0 : index
    %c0_0 = arith.constant 0 : index
    %c0_1 = arith.constant 0 : index
    %c0_2 = arith.constant 0 : index
    %0 = vector.load %arg1[%c0, %c0_0, %c0_1, %c0_2] : memref<1x18x18x4xf32, #tpu.memory_space<vmem>>, vector<1x16x16x4xf32>
    %1 = vector.shape_cast %0 : vector<1x16x16x4xf32> to vector<16x16x4xf32>
    %2 = vector.shape_cast %1 : vector<16x16x4xf32> to vector<256x4xf32>
    %c0_3 = arith.constant 0 : index
    %c0_4 = arith.constant 0 : index
    %c0_5 = arith.constant 0 : index
    %3 = vector.load %arg2[%c0_3, %c0_4, %c0_5] : memref<9x4x8xf32, #tpu.memory_space<vmem>>, vector<1x4x8xf32>
    %4 = vector.shape_cast %3 : vector<1x4x8xf32> to vector<4x8xf32>
    %cst = arith.constant dense<0.000000e+00> : vector<256x8xf32>
    %5 = tpu.matmul %2, %4, %cst {dimension_numbers = #tpu.dot_dimension_numbers<[1], [0], [0], [1], [0, 0, 1, 1], [], []>} : vector<256x4xf32>, vector<4x8xf32>, vector<256x8xf32> -> vector<256x8xf32>
    %c0_6 = arith.constant 0 : index
    %c0_7 = arith.constant 0 : index
    %c1 = arith.constant 1 : index
    %c0_8 = arith.constant 0 : index
    %6 = vector.load %arg1[%c0_6, %c0_7, %c1, %c0_8] : memref<1x18x18x4xf32, #tpu.memory_space<vmem>>, vector<1x16x16x4xf32>
    %7 = vector.shape_cast %6 : vector<1x16x16x4xf32> to vector<16x16x4xf32>
    %8 = vector.shape_cast %7 : vector<16x16x4xf32> to vector<256x4xf32>
    %c1_9 = arith.constant 1 : index
    %c0_10 = arith.constant 0 : index
    %c0_11 = arith.constant 0 : index
    %9 = vector.load %arg2[%c1_9, %c0_10, %c0_11] : memref<9x4x8xf32, #tpu.memory_space<vmem>>, vector<1x4x8xf32>
    %10 = vector.shape_cast %9 : vector<1x4x8xf32> to vector<4x8xf32>
    %cst_12 = arith.constant dense<0.000000e+00> : vector<256x8xf32>
    %11 = tpu.matmul %8, %10, %cst_12 {dimension_numbers = #tpu.dot_dimension_numbers<[1], [0], [0], [1], [0, 0, 1, 1], [], []>} : vector<256x4xf32>, vector<4x8xf32>, vector<256x8xf32> -> vector<256x8xf32>
    %12 = arith.addf %5, %11 : vector<256x8xf32>
    %c0_13 = arith.constant 0 : index
    %c0_14 = arith.constant 0 : index
    %c2 = arith.constant 2 : index
    %c0_15 = arith.constant 0 : index
    %13 = vector.load %arg1[%c0_13, %c0_14, %c2, %c0_15] : memref<1x18x18x4xf32, #tpu.memory_space<vmem>>, vector<1x16x16x4xf32>
    %14 = vector.shape_cast %13 : vector<1x16x16x4xf32> to vector<16x16x4xf32>
    %15 = vector.shape_cast %14 : vector<16x16x4xf32> to vector<256x4xf32>
    %c2_16 = arith.constant 2 : index
    %c0_17 = arith.constant 0 : index
    %c0_18 = arith.constant 0 : index
    %16 = vector.load %arg2[%c2_16, %c0_17, %c0_18] : memref<9x4x8xf32, #tpu.memory_space<vmem>>, vector<1x4x8xf32>
    %17 = vector.shape_cast %16 : vector<1x4x8xf32> to vector<4x8xf32>
    %cst_19 = arith.constant dense<0.000000e+00> : vector<256x8xf32>
    %18 = tpu.matmul %15, %17, %cst_19 {dimension_numbers = #tpu.dot_dimension_numbers<[1], [0], [0], [1], [0, 0, 1, 1], [], []>} : vector<256x4xf32>, vector<4x8xf32>, vector<256x8xf32> -> vector<256x8xf32>
    %19 = arith.addf %12, %18 : vector<256x8xf32>
    %c0_20 = arith.constant 0 : index
    %c1_21 = arith.constant 1 : index
    %c0_22 = arith.constant 0 : index
    %c0_23 = arith.constant 0 : index
    %20 = vector.load %arg1[%c0_20, %c1_21, %c0_22, %c0_23] : memref<1x18x18x4xf32, #tpu.memory_space<vmem>>, vector<1x16x16x4xf32>
    %21 = vector.shape_cast %20 : vector<1x16x16x4xf32> to vector<16x16x4xf32>
    %22 = vector.shape_cast %21 : vector<16x16x4xf32> to vector<256x4xf32>
    %c3 = arith.constant 3 : index
    %c0_24 = arith.constant 0 : index
    %c0_25 = arith.constant 0 : index
    %23 = vector.load %arg2[%c3, %c0_24, %c0_25] : memref<9x4x8xf32, #tpu.memory_space<vmem>>, vector<1x4x8xf32>
    %24 = vector.shape_cast %23 : vector<1x4x8xf32> to vector<4x8xf32>
    %cst_26 = arith.constant dense<0.000000e+00> : vector<256x8xf32>
    %25 = tpu.matmul %22, %24, %cst_26 {dimension_numbers = #tpu.dot_dimension_numbers<[1], [0], [0], [1], [0, 0, 1, 1], [], []>} : vector<256x4xf32>, vector<4x8xf32>, vector<256x8xf32> -> vector<256x8xf32>
    %26 = arith.addf %19, %25 : vector<256x8xf32>
    %c0_27 = arith.constant 0 : index
    %c1_28 = arith.constant 1 : index
    %c1_29 = arith.constant 1 : index
    %c0_30 = arith.constant 0 : index
    %27 = vector.load %arg1[%c0_27, %c1_28, %c1_29, %c0_30] : memref<1x18x18x4xf32, #tpu.memory_space<vmem>>, vector<1x16x16x4xf32>
    %28 = vector.shape_cast %27 : vector<1x16x16x4xf32> to vector<16x16x4xf32>
    %29 = vector.shape_cast %28 : vector<16x16x4xf32> to vector<256x4xf32>
    %c4 = arith.constant 4 : index
    %c0_31 = arith.constant 0 : index
    %c0_32 = arith.constant 0 : index
    %30 = vector.load %arg2[%c4, %c0_31, %c0_32] : memref<9x4x8xf32, #tpu.memory_space<vmem>>, vector<1x4x8xf32>
    %31 = vector.shape_cast %30 : vector<1x4x8xf32> to vector<4x8xf32>
    %cst_33 = arith.constant dense<0.000000e+00> : vector<256x8xf32>
    %32 = tpu.matmul %29, %31, %cst_33 {dimension_numbers = #tpu.dot_dimension_numbers<[1], [0], [0], [1], [0, 0, 1, 1], [], []>} : vector<256x4xf32>, vector<4x8xf32>, vector<256x8xf32> -> vector<256x8xf32>
    %33 = arith.addf %26, %32 : vector<256x8xf32>
    %c0_34 = arith.constant 0 : index
    %c1_35 = arith.constant 1 : index
    %c2_36 = arith.constant 2 : index
    %c0_37 = arith.constant 0 : index
    %34 = vector.load %arg1[%c0_34, %c1_35, %c2_36, %c0_37] : memref<1x18x18x4xf32, #tpu.memory_space<vmem>>, vector<1x16x16x4xf32>
    %35 = vector.shape_cast %34 : vector<1x16x16x4xf32> to vector<16x16x4xf32>
    %36 = vector.shape_cast %35 : vector<16x16x4xf32> to vector<256x4xf32>
    %c5 = arith.constant 5 : index
    %c0_38 = arith.constant 0 : index
    %c0_39 = arith.constant 0 : index
    %37 = vector.load %arg2[%c5, %c0_38, %c0_39] : memref<9x4x8xf32, #tpu.memory_space<vmem>>, vector<1x4x8xf32>
    %38 = vector.shape_cast %37 : vector<1x4x8xf32> to vector<4x8xf32>
    %cst_40 = arith.constant dense<0.000000e+00> : vector<256x8xf32>
    %39 = tpu.matmul %36, %38, %cst_40 {dimension_numbers = #tpu.dot_dimension_numbers<[1], [0], [0], [1], [0, 0, 1, 1], [], []>} : vector<256x4xf32>, vector<4x8xf32>, vector<256x8xf32> -> vector<256x8xf32>
    %40 = arith.addf %33, %39 : vector<256x8xf32>
    %c0_41 = arith.constant 0 : index
    %c2_42 = arith.constant 2 : index
    %c0_43 = arith.constant 0 : index
    %c0_44 = arith.constant 0 : index
    %41 = vector.load %arg1[%c0_41, %c2_42, %c0_43, %c0_44] : memref<1x18x18x4xf32, #tpu.memory_space<vmem>>, vector<1x16x16x4xf32>
    %42 = vector.shape_cast %41 : vector<1x16x16x4xf32> to vector<16x16x4xf32>
    %43 = vector.shape_cast %42 : vector<16x16x4xf32> to vector<256x4xf32>
    %c6 = arith.constant 6 : index
    %c0_45 = arith.constant 0 : index
    %c0_46 = arith.constant 0 : index
    %44 = vector.load %arg2[%c6, %c0_45, %c0_46] : memref<9x4x8xf32, #tpu.memory_space<vmem>>, vector<1x4x8xf32>
    %45 = vector.shape_cast %44 : vector<1x4x8xf32> to vector<4x8xf32>
    %cst_47 = arith.constant dense<0.000000e+00> : vector<256x8xf32>
    %46 = tpu.matmul %43, %45, %cst_47 {dimension_numbers = #tpu.dot_dimension_numbers<[1], [0], [0], [1], [0, 0, 1, 1], [], []>} : vector<256x4xf32>, vector<4x8xf32>, vector<256x8xf32> -> vector<256x8xf32>
    %47 = arith.addf %40, %46 : vector<256x8xf32>
    %c0_48 = arith.constant 0 : index
    %c2_49 = arith.constant 2 : index
    %c1_50 = arith.constant 1 : index
    %c0_51 = arith.constant 0 : index
    %48 = vector.load %arg1[%c0_48, %c2_49, %c1_50, %c0_51] : memref<1x18x18x4xf32, #tpu.memory_space<vmem>>, vector<1x16x16x4xf32>
    %49 = vector.shape_cast %48 : vector<1x16x16x4xf32> to vector<16x16x4xf32>
    %50 = vector.shape_cast %49 : vector<16x16x4xf32> to vector<256x4xf32>
    %c7 = arith.constant 7 : index
    %c0_52 = arith.constant 0 : index
    %c0_53 = arith.constant 0 : index
    %51 = vector.load %arg2[%c7, %c0_52, %c0_53] : memref<9x4x8xf32, #tpu.memory_space<vmem>>, vector<1x4x8xf32>
    %52 = vector.shape_cast %51 : vector<1x4x8xf32> to vector<4x8xf32>
    %cst_54 = arith.constant dense<0.000000e+00> : vector<256x8xf32>
    %53 = tpu.matmul %50, %52, %cst_54 {dimension_numbers = #tpu.dot_dimension_numbers<[1], [0], [0], [1], [0, 0, 1, 1], [], []>} : vector<256x4xf32>, vector<4x8xf32>, vector<256x8xf32> -> vector<256x8xf32>
    %54 = arith.addf %47, %53 : vector<256x8xf32>
    %c0_55 = arith.constant 0 : index
    %c2_56 = arith.constant 2 : index
    %c2_57 = arith.constant 2 : index
    %c0_58 = arith.constant 0 : index
    %55 = vector.load %arg1[%c0_55, %c2_56, %c2_57, %c0_58] : memref<1x18x18x4xf32, #tpu.memory_space<vmem>>, vector<1x16x16x4xf32>
    %56 = vector.shape_cast %55 : vector<1x16x16x4xf32> to vector<16x16x4xf32>
    %57 = vector.shape_cast %56 : vector<16x16x4xf32> to vector<256x4xf32>
    %c8 = arith.constant 8 : index
    %c0_59 = arith.constant 0 : index
    %c0_60 = arith.constant 0 : index
    %58 = vector.load %arg2[%c8, %c0_59, %c0_60] : memref<9x4x8xf32, #tpu.memory_space<vmem>>, vector<1x4x8xf32>
    %59 = vector.shape_cast %58 : vector<1x4x8xf32> to vector<4x8xf32>
    %cst_61 = arith.constant dense<0.000000e+00> : vector<256x8xf32>
    %60 = tpu.matmul %57, %59, %cst_61 {dimension_numbers = #tpu.dot_dimension_numbers<[1], [0], [0], [1], [0, 0, 1, 1], [], []>} : vector<256x4xf32>, vector<4x8xf32>, vector<256x8xf32> -> vector<256x8xf32>
    %61 = arith.addf %54, %60 : vector<256x8xf32>
    %c0_62 = arith.constant 0 : index
    %c0_63 = arith.constant 0 : index
    %62 = vector.load %arg3[%c0_62, %c0_63] : memref<1x8xf32, #tpu.memory_space<vmem>>, vector<1x8xf32>
    %63 = vector.broadcast %62 : vector<1x8xf32> to vector<256x8xf32>
    %64 = arith.addf %61, %63 : vector<256x8xf32>
    %cst_64 = arith.constant 0.000000e+00 : f32
    %65 = vector.broadcast %cst_64 : f32 to vector<256x8xf32>
    %66 = arith.maximumf %64, %65 : vector<256x8xf32>
    %67 = tpu.transpose %66, [1, 0] : vector<256x8xf32> -> vector<8x256xf32>
    %c0_65 = arith.constant 0 : index
    %c0_66 = arith.constant 0 : index
    %c0_67 = arith.constant 0 : index
    %68 = vector.load %arg4[%c0_65, %c0_66, %c0_67] : memref<1x8x256xf32, #tpu.memory_space<vmem>>, vector<1x8x256xf32>
    %69 = vector.shape_cast %68 : vector<1x8x256xf32> to vector<8x256xf32>
    %70 = vector.shape_cast %67 : vector<8x256xf32> to vector<1x8x256xf32>
    tpu.vector_store %arg4[%c0_65, %c0_66, %c0_67], %70 {strides = array<i32>} : memref<1x8x256xf32, #tpu.memory_space<vmem>>, vector<1x8x256xf32>,
    return
  }
  func.func @transform_0(%arg0: i32) -> (i32, i32, i32, i32) {
    %c0_i32 = arith.constant 0 : i32
    %c0_i32_0 = arith.constant 0 : i32
    %c0_i32_1 = arith.constant 0 : i32
    %c0_i32_2 = arith.constant 0 : i32
    return %arg0, %c0_i32, %c0_i32_0, %c0_i32_1 : i32, i32, i32, i32
  }
  func.func @transform_1(%arg0: i32) -> (i32, i32, i32) {
    %c0_i32 = arith.constant 0 : i32
    %c0_i32_0 = arith.constant 0 : i32
    %c0_i32_1 = arith.constant 0 : i32
    %c0_i32_2 = arith.constant 0 : i32
    return %c0_i32, %c0_i32_0, %c0_i32_1 : i32, i32, i32
  }
  func.func @transform_2(%arg0: i32) -> (i32, i32) {
    %c0_i32 = arith.constant 0 : i32
    %c0_i32_0 = arith.constant 0 : i32
    %c0_i32_1 = arith.constant 0 : i32
    return %c0_i32, %c0_i32_0 : i32, i32
  }
  func.func @transform_3(%arg0: i32) -> (i32, i32, i32) {
    %c0_i32 = arith.constant 0 : i32
    %c0_i32_0 = arith.constant 0 : i32
    %c0_i32_1 = arith.constant 0 : i32
    return %arg0, %c0_i32, %c0_i32_0 : i32, i32, i32
  }
}

</mosaic_0001>

<bundles_post_ra>
// kernel: tpu_custom_call.1
= control target key start
LH: loop header
LB: loop body
LE: loop exit
PB: predicated region body
PF: predicated region fallthrough
CT: control target
= control target key end

     0   :  { %8 = vsyncpa [#allocation3], 0  ;;  %s6695_s0 = inlined_call_operand.vmem [shape: f32[2,18,18,4], index: 0, kind: input, shape index: {}]   ;;  %s6696_s1 = inlined_call_operand.vmem [shape: f32[9,4,8], index: 1, kind: input, shape index: {}]   ;;  %s6697_s2 = inlined_call_operand.vmem [shape: f32[1,8], index: 2, kind: input, shape index: {}]   ;;  %s6698_s3 = inlined_call_operand.hbm [shape: f32[2,8,256], index: 3, kind: output, shape index: {}]  }
   0x1   :  { %10 = vsyncpa [#allocation3 + $0x1], 0  ;;  %s5211_s12 = smov 0   ;;  %s5213_s13 = smov 0  }
   0x2   :  { %s5215_s14 = smov 0   ;;  %s5217_s15 = smov 0  }
   0x3 LB: > { %s5232_s16 = sadd.s32 4294967295, %s5188_s15   ;;  %s3829_s17 = sadd.s32 4294967294, %s5188_s15   ;;  %s5188_s15 = sphi %s5217_s15, %s6844_s15   ;;  %s5184_s14 = sphi %s5215_s14, %s6843_s14   ;;  %s5180_s13 = sphi %s5213_s13, %s6842_s13   ;;  %s5176_s12 = sphi %s5211_s12, %s6841_s12  }
   0x4   : > { %s5236_s18 = sadd.s32 1, %s5188_s15   ;;  %s91_s19 = sadd.s32 1, %s5184_s14 }
   0x5   : > { %s88_s20 = ssub.s32 %s5188_s15, %s5236_s18  ;;  %p101_p0 = scmp.ne.s32.totalorder %s5184_s14, %s5180_s13 }
   0x6   : > { %p89_p1 = scmp.eq.s32.totalorder %s88_s20, 0  ;;  %p102_p2 = scmp.eq.s32.totalorder %s5232_s16, 1 }
   0x7   : > { %p107_p3 = scmp.ne.s32.totalorder %s5180_s13, %s5176_s12  ;;  %p108_p4 = scmp.eq.s32.totalorder %s3829_s17, 1 }
   0x8   : > { %s5247_s21 = scalar_select %p89_p1, %s5184_s14, %s91_s19  }
   0x9   : > { %p5249_p5 = por %p102_p2, %p101_p0  ;;  %p5253_p6 = por %p108_p4, %p107_p3 }
   0xa   : > { %p3832_p7 = scmp.ge.s32.totalorder %s5188_s15, 1  ;;  %p140_p8 = scmp.lt.s32.totalorder %s5188_s15, 3 }
   0xc   : > { %p141_p9 = pnand %p3832_p7, %p140_p8 }
   0xe   : > { %144 = sbr.rel (%p141_p9) target bundleno = 626 (0x272), region = 32 }
  0x13   : > { %v3835_v0 = vld [vmem:[%s6696_s1 + $0x4] sm:$0xf]  ;;  %vm333_vm0 = vcmask 1043456   ;;  %p164_p10 = scmp.lt.s32.totalorder %s5232_s16, 1  ;;  %v201_v1 = vld [vmem:[%s6696_s1] sm:$0xf] }
  0x14   : > { %5086 = vmatprep.subr.msk.mxu1 %vm333_vm0, %v3835_v0  ;;  %4636 = vmatprep.subr.msk.mxu0 %vm333_vm0, %v3835_v0  ;;  %v3902_v2 = vld [vmem:[%s6696_s1 + $0x8] sm:$0xf]  ;;  %vm236_vm1 = vcmask 31744   ;;  %v5304_v9 = vld [vmem:[%s6696_s1 + $0xc] sm:$0xf]  ;;  %s4338_s8 = sshll.u32 %s5232_s16, 8 }
  0x15   : > { %5087 = vmatpush3.msk.msra.mxu1 %vm333_vm0, %v3835_v0  ;;  %4637 = vmatpush3.msk.msra.mxu0 %vm333_vm0, %v3835_v0  ;;  %s165_s30 = scalar_select %p164_p10, %s5232_s16, 1  ;;  %v5309_v10 = vld [vmem:[%s6696_s1 + $0x10] sm:$0xf]  ;;  %v5468_v43 = vld [vmem:[%s6696_s1 + $0x14] sm:$0xf] }
  0x16   : > { %4686 = vmatprep.subr.msk.mxu1 %vm333_vm0, %v201_v1  ;;  %4736 = vmatprep.subr.msk.mxu0 %vm333_vm0, %v3902_v2  ;;  %v5473_v44 = vld [vmem:[%s6696_s1 + $0x18] sm:$0xf]  ;;  %s3768_s11 = scalar_lea.hbm %s6698_s3, %s4338_s8  ;;  %s5190_s20 = smov [#allocation2]  }
  0x17   : > { %s5088_s4 = smul.u32 432, %s165_s30  ;;  %s5132_s24 = sshll.u32 %s5190_s20, 4  ;;  %s5133_s24 = int_to_ptr.vmem [resolvable:$false] %s5132_s24 }
  0x18   : > { %s5134_s16 = scalar_lea.vmem %s5133_s24, 512 }
  0x19   : > { %s5279_s7 = scalar_lea.vmem %s6695_s0, %s5088_s4  ;;  %s161_s4 = sand.u32 1, %s5180_s13  }
  0x1a   : > { %v202_v3 = vld [vmem:[%s5279_s7 + $0x1] sm:$0xff]  ;;  %v203_v5 = vld [vmem:[%s5279_s7 + $0x9] sm:$0xff]  ;;  %v5293_v7 = vld [vmem:[%s5279_s7 + $0x19] sm:$0xff]  ;;  %s3833_s5 = sshll.u32 %s161_s4, 4  ;;  %s3756_s17 = scalar_lea.sflag [#allocation3], %s161_s4 }
  0x1b   : > { %v5283_v4 = vld [vmem:[%s5279_s7 + $0xc1] sm:$0xff]  ;;  %4638 = vmatprep.mubr.msk.f32.mxu0 %vm236_vm1, %v202_v3  ;;  %v5290_v6 = vld [vmem:[%s5279_s7 + $0xc9] sm:$0xff]  ;;  %v5296_v8 = vld [vmem:[%s5279_s7 + $0xd9] sm:$0xff]  ;;  %s163_s6 = scalar_lea.vmem [#allocation2], %s3833_s5 }
  0x1c   : > { %4662 = vmatprep.mubr.msk.f32.mxu1 %vm236_vm1, %v5283_v4  ;;  %4639 = vmatmul.mubr.msk.f32.vlgmr.msra.gmra.mxu0 %vm236_vm1, %v203_v5  ;;  %v5314_v11 = vld [vmem:[%s5279_s7 + $0x21] sm:$0xff]  ;;  %v5324_v13 = vld [vmem:[%s5279_s7 + $0x31] sm:$0xff]  ;;  %v5342_v15 = vld [vmem:[%s5279_s7 + $0x39] sm:$0xff] }
  0x1d   : > { %4663 = vmatmul.mubr.msk.f32.vlgmr.msra.gmra.mxu1 %vm236_vm1, %v5290_v6  ;;  %4737 = vmatpush3.msk.msra.mxu0 %vm333_vm0, %v3902_v2  ;;  %v5317_v12 = vld [vmem:[%s5279_s7 + $0xe1] sm:$0xff]  ;;  %v5327_v14 = vld [vmem:[%s5279_s7 + $0xf1] sm:$0xff]  ;;  %v5345_v16 = vld [vmem:[%s5279_s7 + $0xf9] sm:$0xff] }
  0x1e   : > { %4687 = vmatpush3.msk.msra.mxu1 %vm333_vm0, %v201_v1  ;;  %4641 = vmatprep.mubr.msk.f32.mxu0 %vm236_vm1, %v5293_v7  ;;  %v5348_v17 = vld [vmem:[%s5279_s7 + $0x49] sm:$0xff]  ;;  %v5362_v19 = vld [vmem:[%s5279_s7 + $0x51] sm:$0xff]  ;;  %v5368_v21 = vld [vmem:[%s5279_s7 + $0x61] sm:$0xff] }
  0x1f   : > { %4665 = vmatprep.mubr.msk.f32.mxu1 %vm236_vm1, %v5296_v8  ;;  %4786 = vmatprep.subr.msk.mxu1 %vm333_vm0, %v5304_v9  ;;  %v5351_v18 = vld [vmem:[%s5279_s7 + $0x109] sm:$0xff]  ;;  %v5365_v20 = vld [vmem:[%s5279_s7 + $0x111] sm:$0xff]  ;;  %v5371_v22 = vld [vmem:[%s5279_s7 + $0x121] sm:$0xff] }
  0x20   : > { %4836 = vmatprep.subr.msk.mxu0 %vm333_vm0, %v5309_v10  ;;  %4642 = vmatmul.mubr.msk.f32.gmra.mxu0 %vm236_vm1, %v5314_v11  ;;  %v5382_v23 = vld [vmem:[%s5279_s7 + $0x69] sm:$0xff]  ;;  %v5388_v25 = vld [vmem:[%s5279_s7 + $0x79] sm:$0xff]  ;;  %v5402_v27 = vld [vmem:[%s5279_s7 + $0x81] sm:$0xff] }
  0x21   : > { %4666 = vmatmul.mubr.msk.f32.gmra.mxu1 %vm236_vm1, %v5317_v12  ;;  %4644 = vmatprep.mubr.msk.f32.mxu0 %vm236_vm1, %v5324_v13  ;;  %v5385_v24 = vld [vmem:[%s5279_s7 + $0x129] sm:$0xff]  ;;  %v5391_v26 = vld [vmem:[%s5279_s7 + $0x139] sm:$0xff]  ;;  %v5405_v28 = vld [vmem:[%s5279_s7 + $0x141] sm:$0xff] }
  0x22   : > { %4668 = vmatprep.mubr.msk.f32.mxu1 %vm236_vm1, %v5327_v14  ;;  %v5408_v29 = vld [vmem:[%s5279_s7 + $0x91] sm:$0xff]  ;;  %v5422_v31 = vld [vmem:[%s5279_s7 + $0x99] sm:$0xff]  ;;  %v5428_v33 = vld [vmem:[%s5279_s7 + $0xa9] sm:$0xff] }
  0x23   : > { %v5411_v30 = vld [vmem:[%s5279_s7 + $0x151] sm:$0xff]  ;;  %v5425_v32 = vld [vmem:[%s5279_s7 + $0x159] sm:$0xff]  ;;  %v5431_v34 = vld [vmem:[%s5279_s7 + $0x169] sm:$0xff] }
  0x24   : > { %4645 = vmatmul.mubr.msk.f32.gmra.mxu0 %vm236_vm1, %v5342_v15  ;;  %v5442_v35 = vld [vmem:[%s5279_s7 + $0xb1] sm:$0xff]  ;;  %v169_v37 = vld [vmem:[%s5279_s7] sm:$0xff]  ;;  %v170_v39 = vld [vmem:[%s5279_s7 + $0x8] sm:$0xff] }
  0x25   : > { %4669 = vmatmul.mubr.msk.f32.gmra.mxu1 %vm236_vm1, %v5345_v16  ;;  %4647 = vmatprep.mubr.msk.f32.mxu0 %vm236_vm1, %v5348_v17  ;;  %v5445_v36 = vld [vmem:[%s5279_s7 + $0x171] sm:$0xff]  ;;  %v886_v38 = vld [vmem:[%s5279_s7 + $0x2] sm:$0xff]  ;;  %v5461_v42 = vld [vmem:[%s5279_s7 + $0x1a] sm:$0xff] }
  0x26   : > { %4671 = vmatprep.mubr.msk.f32.mxu1 %vm236_vm1, %v5351_v18  ;;  %6759 = vst [vmem:[#allocation5_spill] sm:$0xff] %v5445_v36  ;;  %v887_v40 = vld [vmem:[%s5279_s7 + $0xa] sm:$0xff]  ;;  %v5458_v41 = vld [vmem:[%s5279_s7 + $0x18] sm:$0xff]  ;;  %6760 = vst [vmem:[#allocation6_spill] sm:$0xff] %v5461_v42 }
  0x27   : > { %v5480_v45 = vld [vmem:[%s5279_s7 + $0x20] sm:$0xff]  ;;  %v5490_v47 = vld [vmem:[%s5279_s7 + $0x30] sm:$0xff]  ;;  %v5508_v49 = vld [vmem:[%s5279_s7 + $0x38] sm:$0xff] }
  0x28   : > { %4648 = vmatmul.mubr.msk.f32.gmra.mxu0 %vm236_vm1, %v5362_v19  ;;  %v5483_v46 = vld [vmem:[%s5279_s7 + $0x22] sm:$0xff]  ;;  %v5493_v48 = vld [vmem:[%s5279_s7 + $0x32] sm:$0xff]  ;;  %v5511_v50 = vld [vmem:[%s5279_s7 + $0x3a] sm:$0xff] }
  0x29   : > { %4672 = vmatmul.mubr.msk.f32.gmra.mxu1 %vm236_vm1, %v5365_v20  ;;  %4650 = vmatprep.mubr.msk.f32.mxu0 %vm236_vm1, %v5368_v21  ;;  %6761 = vst [vmem:[#allocation7_spill] sm:$0xff] %v5483_v46  ;;  %6762 = vst [vmem:[#allocation8_spill] sm:$0xff] %v5493_v48  ;;  %v5514_v51 = vld [vmem:[%s5279_s7 + $0x48] sm:$0xff]  ;;  %v5528_v53 = vld [vmem:[%s5279_s7 + $0x50] sm:$0xff] }
  0x2a   : > { %4674 = vmatprep.mubr.msk.f32.mxu1 %vm236_vm1, %v5371_v22  ;;  %6763 = vst [vmem:[#allocation9_spill] sm:$0xff] %v5511_v50  ;;  %v5517_v52 = vld [vmem:[%s5279_s7 + $0x4a] sm:$0xff]  ;;  %v5531_v54 = vld [vmem:[%s5279_s7 + $0x52] sm:$0xff]  ;;  %v5534_v55 = vld [vmem:[%s5279_s7 + $0x60] sm:$0xff] }
  0x2b   : > { %6764 = vst [vmem:[#allocation10_spill] sm:$0xff] %v5517_v52  ;;  %6765 = vst [vmem:[#allocation11_spill] sm:$0xff] %v5531_v54  ;;  %v5537_v56 = vld [vmem:[%s5279_s7 + $0x62] sm:$0xff]  ;;  %v5551_v58 = vld [vmem:[%s5279_s7 + $0x6a] sm:$0xff] }
  0x2c   : > { %4651 = vmatmul.mubr.msk.f32.gmra.mxu0 %vm236_vm1, %v5382_v23  ;;  %6766 = vst [vmem:[#allocation12_spill] sm:$0xff] %v5537_v56  ;;  %v5548_v57 = vld [vmem:[%s5279_s7 + $0x68] sm:$0xff]  ;;  %6767 = vst [vmem:[#allocation13_spill] sm:$0xff] %v5551_v58  ;;  %v5554_v59 = vld [vmem:[%s5279_s7 + $0x78] sm:$0xff] }
  0x2d   : > { %4675 = vmatmul.mubr.msk.f32.gmra.mxu1 %vm236_vm1, %v5385_v24  ;;  %4653 = vmatprep.mubr.msk.f32.mxu0 %vm236_vm1, %v5388_v25  ;;  %v5557_v60 = vld [vmem:[%s5279_s7 + $0x7a] sm:$0xff]  ;;  %v5571_v62 = vld [vmem:[%s5279_s7 + $0x82] sm:$0xff]  ;;  %v5574_v63 = vld [vmem:[%s5279_s7 + $0x90] sm:$0xff] }
  0x2e   : > { %4677 = vmatprep.mubr.msk.f32.mxu1 %vm236_vm1, %v5391_v26  ;;  %6768 = vst [vmem:[#allocation14_spill] sm:$0xff] %v5557_v60  ;;  %v5568_v61 = vld [vmem:[%s5279_s7 + $0x80] sm:$0xff]  ;;  %6769 = vst [vmem:[#allocation15_spill] sm:$0xff] %v5571_v62  ;;  %v5577_v0 = vld [vmem:[%s5279_s7 + $0x92] sm:$0xff] }
  0x2f   : > { %6770 = vst [vmem:[#allocation16_spill] sm:$0xff] %v5577_v0  ;;  %v5588_v1 = vld [vmem:[%s5279_s7 + $0x98] sm:$0xff]  ;;  %v5594_v3 = vld [vmem:[%s5279_s7 + $0xa8] sm:$0xff] }
  0x30   : > { %4654 = vmatmul.mubr.msk.f32.gmra.mxu0 %vm236_vm1, %v5402_v27  ;;  %v5591_v2 = vld [vmem:[%s5279_s7 + $0x9a] sm:$0xff]  ;;  %v5597_v5 = vld [vmem:[%s5279_s7 + $0xaa] sm:$0xff] }
  0x31   : > { %4678 = vmatmul.mubr.msk.f32.gmra.mxu1 %vm236_vm1, %v5405_v28  ;;  %4656 = vmatprep.mubr.msk.f32.mxu0 %vm236_vm1, %v5408_v29  ;;  %6771 = vst [vmem:[#allocation17_spill] sm:$0xff] %v5591_v2  ;;  %6772 = vst [vmem:[#allocation18_spill] sm:$0xff] %v5597_v5 }
  0x32   : > { %4680 = vmatprep.mubr.msk.f32.mxu1 %vm236_vm1, %v5411_v30 }
  0x34   : > { %4657 = vmatmul.mubr.msk.f32.gmra.mxu0 %vm236_vm1, %v5422_v31 }
  0x35   : > { %4681 = vmatmul.mubr.msk.f32.gmra.mxu1 %vm236_vm1, %v5425_v32  ;;  %4659 = vmatprep.mubr.msk.f32.mxu0 %vm236_vm1, %v5428_v33 }
  0x36   : > { %4683 = vmatprep.mubr.msk.f32.mxu1 %vm236_vm1, %v5431_v34 }
  0x38   : > { %4660 = vmatmul.mubr.msk.f32.gmra.mxu0 %vm236_vm1, %v5442_v35 }
  0x39   : > { %4684 = vmatmul.mubr.msk.f32.gmra.mxu1 %vm236_vm1, %v5445_v36  ;;  %4738 = vmatprep.mubr.msk.f32.mxu0 %vm236_vm1, %v886_v38  ;;  %v5617_v38 = vld [vmem:[%s5279_s7 + $0xc2] sm:$0xff]  ;;  %v5757_v36 = vld [vmem:[%s5279_s7 + $0x16a] sm:$0xff] }
  0x3a   : > { %4688 = vmatprep.mubr.msk.f32.mxu1 %vm236_vm1, %v169_v37  ;;  %v5614_v37 = vld [vmem:[%s5279_s7 + $0xc0] sm:$0xff]  ;;  %6774 = vst [vmem:[#allocation20_spill] sm:$0xff] %v5617_v38  ;;  %6787 = vst [vmem:[#allocation33_spill] sm:$0xff] %v5757_v36 }
  0x3c   : > { %4739 = vmatmul.mubr.msk.f32.vlgmr.msra.gmra.mxu0 %vm236_vm1, %v887_v40  ;;  %v5631_v40 = vld [vmem:[%s5279_s7 + $0xca] sm:$0xff] }
  0x3d   : > { %4689 = vmatmul.mubr.msk.f32.vlgmr.msra.gmra.mxu1 %vm236_vm1, %v170_v39  ;;  %4837 = vmatpush3.msk.msra.mxu0 %vm333_vm0, %v5309_v10  ;;  %v5611_v10 = vld [vmem:[%s5279_s7 + $0xb2] sm:$0xff]  ;;  %v5628_v39 = vld [vmem:[%s5279_s7 + $0xc8] sm:$0xff]  ;;  %6775 = vst [vmem:[#allocation21_spill] sm:$0xff] %v5631_v40 }
  0x3e   : > { %4787 = vmatpush3.msk.msra.mxu1 %vm333_vm0, %v5304_v9  ;;  %4691 = vmatprep.mubr.msk.f32.mxu1 %vm236_vm1, %v5458_v41  ;;  %v5608_v9 = vld [vmem:[%s5279_s7 + $0xb0] sm:$0xff]  ;;  %6773 = vst [vmem:[#allocation19_spill] sm:$0xff] %v5611_v10 }
  0x3f   : > { %4741 = vmatprep.mubr.msk.f32.mxu0 %vm236_vm1, %v5461_v42  ;;  %4886 = vmatprep.subr.msk.mxu1 %vm333_vm0, %v5468_v43  ;;  %v5754_v42 = vld [vmem:[%s5279_s7 + $0x168] sm:$0xff] }
  0x40   : > { %4936 = vmatprep.subr.msk.mxu0 %vm333_vm0, %v5473_v44  ;;  %4742 = vmatmul.mubr.msk.f32.gmra.mxu0 %vm236_vm1, %v5483_v46  ;;  %v5737_v46 = vld [vmem:[%s5279_s7 + $0x152] sm:$0xff] }
  0x41   : > { %4692 = vmatmul.mubr.msk.f32.gmra.mxu1 %vm236_vm1, %v5480_v45  ;;  %4744 = vmatprep.mubr.msk.f32.mxu0 %vm236_vm1, %v5493_v48  ;;  %v5734_v48 = vld [vmem:[%s5279_s7 + $0x150] sm:$0xff]  ;;  %6786 = vst [vmem:[#allocation32_spill] sm:$0xff] %v5737_v46 }
  0x42   : > { %4694 = vmatprep.mubr.msk.f32.mxu1 %vm236_vm1, %v5490_v47 }
  0x44   : > { %4745 = vmatmul.mubr.msk.f32.gmra.mxu0 %vm236_vm1, %v5511_v50  ;;  %v5717_v50 = vld [vmem:[%s5279_s7 + $0x13a] sm:$0xff] }
  0x45   : > { %4695 = vmatmul.mubr.msk.f32.gmra.mxu1 %vm236_vm1, %v5508_v49  ;;  %4747 = vmatprep.mubr.msk.f32.mxu0 %vm236_vm1, %v5517_v52  ;;  %v5714_v52 = vld [vmem:[%s5279_s7 + $0x138] sm:$0xff]  ;;  %6784 = vst [vmem:[#allocation30_spill] sm:$0xff] %v5717_v50 }
  0x46   : > { %4697 = vmatprep.mubr.msk.f32.mxu1 %vm236_vm1, %v5514_v51 }
  0x48   : > { %4748 = vmatmul.mubr.msk.f32.gmra.mxu0 %vm236_vm1, %v5531_v54  ;;  %v5697_v54 = vld [vmem:[%s5279_s7 + $0x122] sm:$0xff] }
  0x49   : > { %4698 = vmatmul.mubr.msk.f32.gmra.mxu1 %vm236_vm1, %v5528_v53  ;;  %4750 = vmatprep.mubr.msk.f32.mxu0 %vm236_vm1, %v5537_v56  ;;  %v5694_v56 = vld [vmem:[%s5279_s7 + $0x120] sm:$0xff]  ;;  %6782 = vst [vmem:[#allocation28_spill] sm:$0xff] %v5697_v54 }
  0x4a   : > { %4700 = vmatprep.mubr.msk.f32.mxu1 %vm236_vm1, %v5534_v55 }
  0x4c   : > { %4751 = vmatmul.mubr.msk.f32.gmra.mxu0 %vm236_vm1, %v5551_v58  ;;  %v5677_v58 = vld [vmem:[%s5279_s7 + $0x10a] sm:$0xff] }
  0x4d   : > { %4701 = vmatmul.mubr.msk.f32.gmra.mxu1 %vm236_vm1, %v5548_v57  ;;  %4753 = vmatprep.mubr.msk.f32.mxu0 %vm236_vm1, %v5557_v60  ;;  %v5674_v60 = vld [vmem:[%s5279_s7 + $0x108] sm:$0xff]  ;;  %6780 = vst [vmem:[#allocation26_spill] sm:$0xff] %v5677_v58 }
  0x4e   : > { %4703 = vmatprep.mubr.msk.f32.mxu1 %vm236_vm1, %v5554_v59 }
  0x50   : > { %4754 = vmatmul.mubr.msk.f32.gmra.mxu0 %vm236_vm1, %v5571_v62  ;;  %v5657_v62 = vld [vmem:[%s5279_s7 + $0xf2] sm:$0xff] }
  0x51   : > { %4704 = vmatmul.mubr.msk.f32.gmra.mxu1 %vm236_vm1, %v5568_v61  ;;  %4756 = vmatprep.mubr.msk.f32.mxu0 %vm236_vm1, %v5577_v0  ;;  %v5654_v0 = vld [vmem:[%s5279_s7 + $0xf0] sm:$0xff]  ;;  %6778 = vst [vmem:[#allocation24_spill] sm:$0xff] %v5657_v62 }
  0x52   : > { %4706 = vmatprep.mubr.msk.f32.mxu1 %vm236_vm1, %v5574_v63 }
  0x54   : > { %4757 = vmatmul.mubr.msk.f32.gmra.mxu0 %vm236_vm1, %v5591_v2  ;;  %v5637_v2 = vld [vmem:[%s5279_s7 + $0xda] sm:$0xff] }
  0x55   : > { %4707 = vmatmul.mubr.msk.f32.gmra.mxu1 %vm236_vm1, %v5588_v1  ;;  %4759 = vmatprep.mubr.msk.f32.mxu0 %vm236_vm1, %v5597_v5  ;;  %v5634_v5 = vld [vmem:[%s5279_s7 + $0xd8] sm:$0xff]  ;;  %6776 = vst [vmem:[#allocation22_spill] sm:$0xff] %v5637_v2 }
  0x56   : > { %4709 = vmatprep.mubr.msk.f32.mxu1 %vm236_vm1, %v5594_v3 }
  0x58   : > { %4760 = vmatmul.mubr.msk.f32.gmra.mxu0 %vm236_vm1, %v5611_v10  ;;  %v5651_v10 = vld [vmem:[%s5279_s7 + $0xe2] sm:$0xff] }
  0x59   : > { %4710 = vmatmul.mubr.msk.f32.gmra.mxu1 %vm236_vm1, %v5608_v9  ;;  %4762 = vmatprep.mubr.msk.f32.mxu0 %vm236_vm1, %v5617_v38  ;;  %v5648_v38 = vld [vmem:[%s5279_s7 + $0xe0] sm:$0xff]  ;;  %6777 = vst [vmem:[#allocation23_spill] sm:$0xff] %v5651_v10 }
  0x5a   : > { %4712 = vmatprep.mubr.msk.f32.mxu1 %vm236_vm1, %v5614_v37 }
  0x5c   : > { %4763 = vmatmul.mubr.msk.f32.gmra.mxu0 %vm236_vm1, %v5631_v40  ;;  %v5671_v40 = vld [vmem:[%s5279_s7 + $0xfa] sm:$0xff] }
  0x5d   : > { %4713 = vmatmul.mubr.msk.f32.gmra.mxu1 %vm236_vm1, %v5628_v39  ;;  %4765 = vmatprep.mubr.msk.f32.mxu0 %vm236_vm1, %v5637_v2  ;;  %v5668_v2 = vld [vmem:[%s5279_s7 + $0xf8] sm:$0xff]  ;;  %6779 = vst [vmem:[#allocation25_spill] sm:$0xff] %v5671_v40 }
  0x5e   : > { %4715 = vmatprep.mubr.msk.f32.mxu1 %vm236_vm1, %v5634_v5 }
  0x60   : > { %4766 = vmatmul.mubr.msk.f32.gmra.mxu0 %vm236_vm1, %v5651_v10  ;;  %v5691_v10 = vld [vmem:[%s5279_s7 + $0x112] sm:$0xff] }
  0x61   : > { %4716 = vmatmul.mubr.msk.f32.gmra.mxu1 %vm236_vm1, %v5648_v38  ;;  %4768 = vmatprep.mubr.msk.f32.mxu0 %vm236_vm1, %v5657_v62  ;;  %v5688_v62 = vld [vmem:[%s5279_s7 + $0x110] sm:$0xff]  ;;  %6781 = vst [vmem:[#allocation27_spill] sm:$0xff] %v5691_v10 }
  0x62   : > { %4718 = vmatprep.mubr.msk.f32.mxu1 %vm236_vm1, %v5654_v0 }
  0x64   : > { %4769 = vmatmul.mubr.msk.f32.gmra.mxu0 %vm236_vm1, %v5671_v40  ;;  %v5711_v40 = vld [vmem:[%s5279_s7 + $0x12a] sm:$0xff] }
  0x65   : > { %4719 = vmatmul.mubr.msk.f32.gmra.mxu1 %vm236_vm1, %v5668_v2  ;;  %4771 = vmatprep.mubr.msk.f32.mxu0 %vm236_vm1, %v5677_v58  ;;  %v5708_v58 = vld [vmem:[%s5279_s7 + $0x128] sm:$0xff]  ;;  %6783 = vst [vmem:[#allocation29_spill] sm:$0xff] %v5711_v40 }
  0x66   : > { %4721 = vmatprep.mubr.msk.f32.mxu1 %vm236_vm1, %v5674_v60 }
  0x68   : > { %4772 = vmatmul.mubr.msk.f32.gmra.mxu0 %vm236_vm1, %v5691_v10  ;;  %v5731_v10 = vld [vmem:[%s5279_s7 + $0x142] sm:$0xff] }
  0x69   : > { %4722 = vmatmul.mubr.msk.f32.gmra.mxu1 %vm236_vm1, %v5688_v62  ;;  %4774 = vmatprep.mubr.msk.f32.mxu0 %vm236_vm1, %v5697_v54  ;;  %v5728_v54 = vld [vmem:[%s5279_s7 + $0x140] sm:$0xff]  ;;  %6785 = vst [vmem:[#allocation31_spill] sm:$0xff] %v5731_v10 }
  0x6a   : > { %4724 = vmatprep.mubr.msk.f32.mxu1 %vm236_vm1, %v5694_v56 }
  0x6c   : > { %4775 = vmatmul.mubr.msk.f32.gmra.mxu0 %vm236_vm1, %v5711_v40  ;;  %v5751_v40 = vld [vmem:[%s5279_s7 + $0x15a] sm:$0xff] }
  0x6d   : > { %4725 = vmatmul.mubr.msk.f32.gmra.mxu1 %vm236_vm1, %v5708_v58  ;;  %4777 = vmatprep.mubr.msk.f32.mxu0 %vm236_vm1, %v5717_v50  ;;  %v5748_v50 = vld [vmem:[%s5279_s7 + $0x158] sm:$0xff] }
  0x6e   : > { %4727 = vmatprep.mubr.msk.f32.mxu1 %vm236_vm1, %v5714_v52 }
  0x70   : > { %4778 = vmatmul.mubr.msk.f32.gmra.mxu0 %vm236_vm1, %v5731_v10  ;;  %v5771_v10 = vld [vmem:[%s5279_s7 + $0x172] sm:$0xff] }
  0x71   : > { %4728 = vmatmul.mubr.msk.f32.gmra.mxu1 %vm236_vm1, %v5728_v54  ;;  %4780 = vmatprep.mubr.msk.f32.mxu0 %vm236_vm1, %v5737_v46  ;;  %v5768_v46 = vld [vmem:[%s5279_s7 + $0x170] sm:$0xff]  ;;  %6788 = vst [vmem:[#allocation34_spill] sm:$0xff] %v5771_v10 }
  0x72   : > { %4730 = vmatprep.mubr.msk.f32.mxu1 %vm236_vm1, %v5734_v48 }
  0x74   : > { %4781 = vmatmul.mubr.msk.f32.gmra.mxu0 %vm236_vm1, %v5751_v40 }
  0x75   : > { %4731 = vmatmul.mubr.msk.f32.gmra.mxu1 %vm236_vm1, %v5748_v50  ;;  %4783 = vmatprep.mubr.msk.f32.mxu0 %vm236_vm1, %v5757_v36  ;;  %v5788_v36 = vld [vmem:[%s6696_s1 + $0x1c] sm:$0xf] }
  0x76   : > { %4733 = vmatprep.mubr.msk.f32.mxu1 %vm236_vm1, %v5754_v42 }
  0x78   : > { %4784 = vmatmul.mubr.msk.f32.gmra.mxu0 %vm236_vm1, %v5771_v10  ;;  %v5793_v10 = vld [vmem:[%s6696_s1 + $0x20] sm:$0xf] }
  0x79   : > { %4734 = vmatmul.mubr.msk.f32.gmra.mxu1 %vm236_vm1, %v5768_v46  ;;  %4838 = vmatprep.mubr.msk.f32.mxu0 %vm236_vm1, %v5293_v7  ;;  %v6790_v7 = vld [vmem:[#allocation5_spill] sm:$0xff] }
  0x7a   : > { %4788 = vmatprep.mubr.msk.f32.mxu1 %vm236_vm1, %v5458_v41 }
  0x7c   : > { %4839 = vmatmul.mubr.msk.f32.vlgmr.msra.gmra.mxu0 %vm236_vm1, %v5314_v11  ;;  %v5929_v11 = vld [vmem:[%s5279_s7 + $0x189] sm:$0xff] }
  0x7d   : > { %4789 = vmatmul.mubr.msk.f32.vlgmr.msra.gmra.mxu1 %vm236_vm1, %v5480_v45  ;;  %4937 = vmatpush3.msk.msra.mxu0 %vm333_vm0, %v5473_v44  ;;  %6791 = vst [vmem:[#allocation5_spill] sm:$0xff] %v5929_v11  ;;  %v6809_v44 = vld [vmem:[#allocation23_spill] sm:$0xff]  ;;  %v6810_v45 = vld [vmem:[#allocation24_spill] sm:$0xff] }
  0x7e   : > { %4887 = vmatpush3.msk.msra.mxu1 %vm333_vm0, %v5468_v43  ;;  %4791 = vmatprep.mubr.msk.f32.mxu1 %vm236_vm1, %v5490_v47 }
  0x7f   : > { %4841 = vmatprep.mubr.msk.f32.mxu0 %vm236_vm1, %v5324_v13  ;;  %4986 = vmatprep.subr.msk.mxu1 %vm333_vm0, %v5788_v36 }
  0x80   : > { %5036 = vmatprep.subr.msk.mxu0 %vm333_vm0, %v5793_v10  ;;  %4842 = vmatmul.mubr.msk.f32.gmra.mxu0 %vm236_vm1, %v5342_v15 }
  0x81   : > { %4792 = vmatmul.mubr.msk.f32.gmra.mxu1 %vm236_vm1, %v5508_v49  ;;  %4844 = vmatprep.mubr.msk.f32.mxu0 %vm236_vm1, %v5348_v17 }
  0x82   : > { %4794 = vmatprep.mubr.msk.f32.mxu1 %vm236_vm1, %v5514_v51 }
  0x84   : > { %4845 = vmatmul.mubr.msk.f32.gmra.mxu0 %vm236_vm1, %v5362_v19 }
  0x85   : > { %4795 = vmatmul.mubr.msk.f32.gmra.mxu1 %vm236_vm1, %v5528_v53  ;;  %4847 = vmatprep.mubr.msk.f32.mxu0 %vm236_vm1, %v5368_v21 }
  0x86   : > { %4797 = vmatprep.mubr.msk.f32.mxu1 %vm236_vm1, %v5534_v55 }
  0x88   : > { %4848 = vmatmul.mubr.msk.f32.gmra.mxu0 %vm236_vm1, %v5382_v23 }
  0x89   : > { %4798 = vmatmul.mubr.msk.f32.gmra.mxu1 %vm236_vm1, %v5548_v57  ;;  %4850 = vmatprep.mubr.msk.f32.mxu0 %vm236_vm1, %v5388_v25 }
  0x8a   : > { %4800 = vmatprep.mubr.msk.f32.mxu1 %vm236_vm1, %v5554_v59 }
  0x8c   : > { %4851 = vmatmul.mubr.msk.f32.gmra.mxu0 %vm236_vm1, %v5402_v27 }
  0x8d   : > { %4801 = vmatmul.mubr.msk.f32.gmra.mxu1 %vm236_vm1, %v5568_v61  ;;  %4853 = vmatprep.mubr.msk.f32.mxu0 %vm236_vm1, %v5408_v29  ;;  %v6801_v29 = vld [vmem:[#allocation15_spill] sm:$0xff] }
  0x8e   : > { %4803 = vmatprep.mubr.msk.f32.mxu1 %vm236_vm1, %v5574_v63 }
  0x90   : > { %4854 = vmatmul.mubr.msk.f32.gmra.mxu0 %vm236_vm1, %v5422_v31  ;;  %v6803_v31 = vld [vmem:[#allocation17_spill] sm:$0xff] }
  0x91   : > { %4804 = vmatmul.mubr.msk.f32.gmra.mxu1 %vm236_vm1, %v5588_v1  ;;  %4856 = vmatprep.mubr.msk.f32.mxu0 %vm236_vm1, %v5428_v33  ;;  %v6805_v33 = vld [vmem:[#allocation19_spill] sm:$0xff] }
  0x92   : > { %4806 = vmatprep.mubr.msk.f32.mxu1 %vm236_vm1, %v5594_v3 }
  0x94   : > { %4857 = vmatmul.mubr.msk.f32.gmra.mxu0 %vm236_vm1, %v5442_v35  ;;  %v6807_v35 = vld [vmem:[#allocation21_spill] sm:$0xff] }
  0x95   : > { %4807 = vmatmul.mubr.msk.f32.gmra.mxu1 %vm236_vm1, %v5608_v9  ;;  %4859 = vmatprep.mubr.msk.f32.mxu0 %vm236_vm1, %v5283_v4  ;;  %v5912_v4 = vld [vmem:[%s5279_s7 + $0x180] sm:$0xff] }
  0x96   : > { %4809 = vmatprep.mubr.msk.f32.mxu1 %vm236_vm1, %v5614_v37 }
  0x98   : > { %4860 = vmatmul.mubr.msk.f32.gmra.mxu0 %vm236_vm1, %v5290_v6  ;;  %v5915_v6 = vld [vmem:[%s5279_s7 + $0x181] sm:$0xff] }
  0x99   : > { %4810 = vmatmul.mubr.msk.f32.gmra.mxu1 %vm236_vm1, %v5628_v39  ;;  %4862 = vmatprep.mubr.msk.f32.mxu0 %vm236_vm1, %v5296_v8  ;;  %6789 = vst [vmem:[#allocation35_spill] sm:$0xff] %v5915_v6  ;;  %v5926_v8 = vld [vmem:[%s5279_s7 + $0x188] sm:$0xff] }
  0x9a   : > { %4812 = vmatprep.mubr.msk.f32.mxu1 %vm236_vm1, %v5634_v5 }
  0x9c   : > { %4863 = vmatmul.mubr.msk.f32.gmra.mxu0 %vm236_vm1, %v5317_v12  ;;  %v6792_v12 = vld [vmem:[#allocation6_spill] sm:$0xff] }
  0x9d   : > { %4813 = vmatmul.mubr.msk.f32.gmra.mxu1 %vm236_vm1, %v5648_v38  ;;  %4865 = vmatprep.mubr.msk.f32.mxu0 %vm236_vm1, %v5327_v14  ;;  %v6793_v14 = vld [vmem:[#allocation7_spill] sm:$0xff] }
  0x9e   : > { %4815 = vmatprep.mubr.msk.f32.mxu1 %vm236_vm1, %v5654_v0 }
  0xa0   : > { %4866 = vmatmul.mubr.msk.f32.gmra.mxu0 %vm236_vm1, %v5345_v16  ;;  %v6794_v16 = vld [vmem:[#allocation8_spill] sm:$0xff] }
  0xa1   : > { %4816 = vmatmul.mubr.msk.f32.gmra.mxu1 %vm236_vm1, %v5668_v2  ;;  %4868 = vmatprep.mubr.msk.f32.mxu0 %vm236_vm1, %v5351_v18  ;;  %v6795_v18 = vld [vmem:[#allocation9_spill] sm:$0xff] }
  0xa2   : > { %4818 = vmatprep.mubr.msk.f32.mxu1 %vm236_vm1, %v5674_v60 }
  0xa4   : > { %4869 = vmatmul.mubr.msk.f32.gmra.mxu0 %vm236_vm1, %v5365_v20  ;;  %v6796_v20 = vld [vmem:[#allocation10_spill] sm:$0xff] }
  0xa5   : > { %4819 = vmatmul.mubr.msk.f32.gmra.mxu1 %vm236_vm1, %v5688_v62  ;;  %4871 = vmatprep.mubr.msk.f32.mxu0 %vm236_vm1, %v5371_v22  ;;  %v6797_v22 = vld [vmem:[#allocation11_spill] sm:$0xff] }
  0xa6   : > { %4821 = vmatprep.mubr.msk.f32.mxu1 %vm236_vm1, %v5694_v56 }
  0xa8   : > { %4872 = vmatmul.mubr.msk.f32.gmra.mxu0 %vm236_vm1, %v5385_v24  ;;  %v6798_v24 = vld [vmem:[#allocation12_spill] sm:$0xff] }
  0xa9   : > { %4822 = vmatmul.mubr.msk.f32.gmra.mxu1 %vm236_vm1, %v5708_v58  ;;  %4874 = vmatprep.mubr.msk.f32.mxu0 %vm236_vm1, %v5391_v26  ;;  %v6799_v26 = vld [vmem:[#allocation13_spill] sm:$0xff] }
  0xaa   : > { %4824 = vmatprep.mubr.msk.f32.mxu1 %vm236_vm1, %v5714_v52 }
  0xac   : > { %4875 = vmatmul.mubr.msk.f32.gmra.mxu0 %vm236_vm1, %v5405_v28  ;;  %v6800_v28 = vld [vmem:[#allocation14_spill] sm:$0xff] }
  0xad   : > { %4825 = vmatmul.mubr.msk.f32.gmra.mxu1 %vm236_vm1, %v5728_v54  ;;  %4877 = vmatprep.mubr.msk.f32.mxu0 %vm236_vm1, %v5411_v30  ;;  %v6802_v30 = vld [vmem:[#allocation16_spill] sm:$0xff] }
  0xae   : > { %4827 = vmatprep.mubr.msk.f32.mxu1 %vm236_vm1, %v5734_v48 }
  0xb0   : > { %4878 = vmatmul.mubr.msk.f32.gmra.mxu0 %vm236_vm1, %v5425_v32  ;;  %v6804_v32 = vld [vmem:[#allocation18_spill] sm:$0xff] }
  0xb1   : > { %4828 = vmatmul.mubr.msk.f32.gmra.mxu1 %vm236_vm1, %v5748_v50  ;;  %4880 = vmatprep.mubr.msk.f32.mxu0 %vm236_vm1, %v5431_v34  ;;  %v6806_v34 = vld [vmem:[#allocation20_spill] sm:$0xff] }
  0xb2   : > { %4830 = vmatprep.mubr.msk.f32.mxu1 %vm236_vm1, %v5754_v42 }
  0xb4   : > { %4881 = vmatmul.mubr.msk.f32.gmra.mxu0 %vm236_vm1, %v6790_v7 }
  0xb5   : > { %4831 = vmatmul.mubr.msk.f32.gmra.mxu1 %vm236_vm1, %v5768_v46  ;;  %4883 = vmatprep.mubr.msk.f32.mxu0 %vm236_vm1, %v5915_v6 }
  0xb6   : > { %4833 = vmatprep.mubr.msk.f32.mxu1 %vm236_vm1, %v5912_v4 }
  0xb8   : > { %4884 = vmatmul.mubr.msk.f32.gmra.mxu0 %vm236_vm1, %v5929_v11  ;;  %v4164_v11 = vld [vmem:[%s5279_s7 + $0x198] sm:$0xff] }
  0xb9   : > { %4834 = vmatmul.mubr.msk.f32.gmra.mxu1 %vm236_vm1, %v5926_v8  ;;  %4938 = vmatprep.mubr.msk.f32.mxu0 %vm236_vm1, %v5490_v47 }
  0xba   : > { %4888 = vmatprep.mubr.msk.f32.mxu1 %vm236_vm1, %v6792_v12 }
  0xbc   : > { %4939 = vmatmul.mubr.msk.f32.vlgmr.msra.gmra.mxu0 %vm236_vm1, %v5508_v49 }
  0xbd   : > { %4889 = vmatmul.mubr.msk.f32.vlgmr.msra.gmra.mxu1 %vm236_vm1, %v6793_v14  ;;  %5037 = vmatpush3.msk.msra.mxu0 %vm333_vm0, %v5793_v10 }
  0xbe   : > { %4987 = vmatpush3.msk.msra.mxu1 %vm333_vm0, %v5788_v36  ;;  %4891 = vmatprep.mubr.msk.f32.mxu1 %vm236_vm1, %v6794_v16  ;;  %v6808_v36 = vld [vmem:[#allocation22_spill] sm:$0xff] }
  0xbf   : > { %4941 = vmatprep.mubr.msk.f32.mxu0 %vm236_vm1, %v5514_v51 }
  0xc0   : > { %4942 = vmatmul.mubr.msk.f32.gmra.mxu0 %vm236_vm1, %v5528_v53 }
  0xc1   : > { %4892 = vmatmul.mubr.msk.f32.gmra.mxu1 %vm236_vm1, %v6795_v18  ;;  %4944 = vmatprep.mubr.msk.f32.mxu0 %vm236_vm1, %v5534_v55  ;;  %v6811_v55 = vld [vmem:[#allocation25_spill] sm:$0xff] }
  0xc2   : > { %4894 = vmatprep.mubr.msk.f32.mxu1 %vm236_vm1, %v6796_v20 }
  0xc4   : > { %4945 = vmatmul.mubr.msk.f32.gmra.mxu0 %vm236_vm1, %v5548_v57  ;;  %v6812_v57 = vld [vmem:[#allocation26_spill] sm:$0xff] }
  0xc5   : > { %4895 = vmatmul.mubr.msk.f32.gmra.mxu1 %vm236_vm1, %v6797_v22  ;;  %4947 = vmatprep.mubr.msk.f32.mxu0 %vm236_vm1, %v5554_v59 }
  0xc6   : > { %4897 = vmatprep.mubr.msk.f32.mxu1 %vm236_vm1, %v6798_v24 }
  0xc8   : > { %4948 = vmatmul.mubr.msk.f32.gmra.mxu0 %vm236_vm1, %v5568_v61 }
  0xc9   : > { %4898 = vmatmul.mubr.msk.f32.gmra.mxu1 %vm236_vm1, %v6799_v26  ;;  %4950 = vmatprep.mubr.msk.f32.mxu0 %vm236_vm1, %v5574_v63 }
  0xca   : > { %4900 = vmatprep.mubr.msk.f32.mxu1 %vm236_vm1, %v6800_v28 }
  0xcc   : > { %4951 = vmatmul.mubr.msk.f32.gmra.mxu0 %vm236_vm1, %v5588_v1 }
  0xcd   : > { %4901 = vmatmul.mubr.msk.f32.gmra.mxu1 %vm236_vm1, %v6801_v29  ;;  %4953 = vmatprep.mubr.msk.f32.mxu0 %vm236_vm1, %v5594_v3 }
  0xce   : > { %4903 = vmatprep.mubr.msk.f32.mxu1 %vm236_vm1, %v6802_v30 }
  0xd0   : > { %4954 = vmatmul.mubr.msk.f32.gmra.mxu0 %vm236_vm1, %v5608_v9 }
  0xd1   : > { %4904 = vmatmul.mubr.msk.f32.gmra.mxu1 %vm236_vm1, %v6803_v31  ;;  %4956 = vmatprep.mubr.msk.f32.mxu0 %vm236_vm1, %v5614_v37 }
  0xd2   : > { %4906 = vmatprep.mubr.msk.f32.mxu1 %vm236_vm1, %v6804_v32 }
  0xd4   : > { %4957 = vmatmul.mubr.msk.f32.gmra.mxu0 %vm236_vm1, %v5628_v39 }
  0xd5   : > { %4907 = vmatmul.mubr.msk.f32.gmra.mxu1 %vm236_vm1, %v6805_v33  ;;  %4959 = vmatprep.mubr.msk.f32.mxu0 %vm236_vm1, %v5634_v5  ;;  %v6815_v5 = vld [vmem:[#allocation29_spill] sm:$0xff] }
  0xd6   : > { %4909 = vmatprep.mubr.msk.f32.mxu1 %vm236_vm1, %v6806_v34 }
  0xd8   : > { %4960 = vmatmul.mubr.msk.f32.gmra.mxu0 %vm236_vm1, %v5648_v38  ;;  %v6817_v38 = vld [vmem:[#allocation31_spill] sm:$0xff] }
  0xd9   : > { %4910 = vmatmul.mubr.msk.f32.gmra.mxu1 %vm236_vm1, %v6807_v35  ;;  %4962 = vmatprep.mubr.msk.f32.mxu0 %vm236_vm1, %v5654_v0  ;;  %v6813_v0 = vld [vmem:[#allocation27_spill] sm:$0xff] }
  0xda   : > { %4912 = vmatprep.mubr.msk.f32.mxu1 %vm236_vm1, %v6808_v36 }
  0xdc   : > { %v6007_v41 = vpop.f32.mrf.mxu0  ;;  %4963 = vmatmul.mubr.msk.f32.gmra.mxu0 %vm236_vm1, %v5668_v2 }
  0xdd   : > { %v6009_v43 = vpop.f32.mrf.mxu1  ;;  %4913 = vmatmul.mubr.msk.f32.gmra.mxu1 %vm236_vm1, %v6809_v44  ;;  %4965 = vmatprep.mubr.msk.f32.mxu0 %vm236_vm1, %v5674_v60 }
  0xde   : > { %4915 = vmatprep.mubr.msk.f32.mxu1 %vm236_vm1, %v6810_v45  ;;  %v6019_v47 = vpop.f32.mrf.mxu0 }
  0xdf   : > { %v6021_v49 = vpop.f32.mrf.mxu1 }
  0xe0   : > { %v6023_v51 = vpop.f32.mrf.mxu0  ;;  %4966 = vmatmul.mubr.msk.f32.gmra.mxu0 %vm236_vm1, %v5688_v62  ;;  %v6814_v62 = vld [vmem:[#allocation28_spill] sm:$0xff] }
  0xe1   : > { %v6025_v53 = vpop.f32.mrf.mxu1  ;;  %4916 = vmatmul.mubr.msk.f32.gmra.mxu1 %vm236_vm1, %v6811_v55  ;;  %4968 = vmatprep.mubr.msk.f32.mxu0 %vm236_vm1, %v5694_v56 }
  0xe2   : > { %4918 = vmatprep.mubr.msk.f32.mxu1 %vm236_vm1, %v6812_v57  ;;  %v6035_v59 = vpop.f32.mrf.mxu0 }
  0xe3   : > { %v6037_v60 = vpop.f32.mrf.mxu1 }
  0xe4   : > { %v6039_v61 = vpop.f32.mrf.mxu0  ;;  %4969 = vmatmul.mubr.msk.f32.gmra.mxu0 %vm236_vm1, %v5708_v58  ;;  %v6816_v58 = vld [vmem:[#allocation30_spill] sm:$0xff] }
  0xe5   : > { %v6041_v63 = vpop.f32.mrf.mxu1  ;;  %4919 = vmatmul.mubr.msk.f32.gmra.mxu1 %vm236_vm1, %v6813_v0  ;;  %4971 = vmatprep.mubr.msk.f32.mxu0 %vm236_vm1, %v5714_v52 }
  0xe6   : > { %4921 = vmatprep.mubr.msk.f32.mxu1 %vm236_vm1, %v6814_v62  ;;  %v6051_v56 = vpop.f32.mrf.mxu0 }
  0xe7   : > { %v6053_v1 = vpop.f32.mrf.mxu1 }
  0xe8   : > { %v6055_v2 = vpop.f32.mrf.mxu0  ;;  %4972 = vmatmul.mubr.msk.f32.gmra.mxu0 %vm236_vm1, %v5728_v54  ;;  %v6818_v54 = vld [vmem:[#allocation32_spill] sm:$0xff] }
  0xe9   : > { %v6057_v3 = vpop.f32.mrf.mxu1  ;;  %4922 = vmatmul.mubr.msk.f32.gmra.mxu1 %vm236_vm1, %v6815_v5  ;;  %4974 = vmatprep.mubr.msk.f32.mxu0 %vm236_vm1, %v5734_v48 }
  0xea   : > { %4924 = vmatprep.mubr.msk.f32.mxu1 %vm236_vm1, %v6816_v58  ;;  %v6067_v52 = vpop.f32.mrf.mxu0 }
  0xeb   : > { %v6069_v9 = vpop.f32.mrf.mxu1 }
  0xec   : > { %v6071_v10 = vpop.f32.mrf.mxu0  ;;  %4975 = vmatmul.mubr.msk.f32.gmra.mxu0 %vm236_vm1, %v5748_v50  ;;  %v6821_v50 = vld [vmem:[#allocation33_spill] sm:$0xff] }
  0xed   : > { %v6073_v37 = vpop.f32.mrf.mxu1  ;;  %4925 = vmatmul.mubr.msk.f32.gmra.mxu1 %vm236_vm1, %v6817_v38  ;;  %4977 = vmatprep.mubr.msk.f32.mxu0 %vm236_vm1, %v5754_v42 }
  0xee   : > { %4927 = vmatprep.mubr.msk.f32.mxu1 %vm236_vm1, %v6818_v54  ;;  %v6083_v48 = vpop.f32.mrf.mxu0  ;;  %v6104_v54 = vld [vmem:[%s5279_s7 + $0x182] sm:$0xff] }
  0xef   : > { %v6085_v39 = vpop.f32.mrf.mxu1  ;;  %6823 = vst [vmem:[#allocation9_spill] sm:$0xff] %v6104_v54 }
  0xf0   : > { %6819 = vst [vmem:[#allocation6_spill] sm:$0xff] %v6085_v39  ;;  %v6087_v7 = vpop.f32.mrf.mxu0  ;;  %4978 = vmatmul.mubr.msk.f32.gmra.mxu0 %vm236_vm1, %v5768_v46  ;;  %v6119_v46 = vld [vmem:[%s5279_s7 + $0x18a] sm:$0xff] }
  0xf1   : > { %v6089_v12 = vpop.f32.mrf.mxu1  ;;  %4928 = vmatmul.mubr.msk.f32.gmra.mxu1 %vm236_vm1, %v5751_v40  ;;  %4980 = vmatprep.mubr.msk.f32.mxu0 %vm236_vm1, %v5912_v4  ;;  %v6825_v40 = vld [vmem:[#allocation34_spill] sm:$0xff]  ;;  %6826 = vst [vmem:[#allocation11_spill] sm:$0xff] %v6119_v46  ;;  %v4165_v4 = vld [vmem:[%s5279_s7 + $0x1a0] sm:$0xff] }
  0xf2   : > { %6820 = vst [vmem:[#allocation7_spill] sm:$0xff] %v6089_v12  ;;  %4930 = vmatprep.mubr.msk.f32.mxu1 %vm236_vm1, %v6821_v50  ;;  %v6099_v42 = vpop.f32.mrf.mxu0 }
  0xf3   : > { %v6101_v14 = vpop.f32.mrf.mxu1 }
  0xf4   : > { %6822 = vst [vmem:[#allocation8_spill] sm:$0xff] %v6101_v14  ;;  %v6107_v6 = vpop.f32.mrf.mxu0  ;;  %4981 = vmatmul.mubr.msk.f32.gmra.mxu0 %vm236_vm1, %v5926_v8 }
  0xf5   : > { %v6109_v12 = vpop.f32.mrf.mxu1  ;;  %4931 = vmatmul.mubr.msk.f32.gmra.mxu1 %vm236_vm1, %v6825_v40  ;;  %4983 = vmatprep.mubr.msk.f32.mxu0 %vm236_vm1, %v4164_v11 }
  0xf6   : > { %6824 = vst [vmem:[#allocation10_spill] sm:$0xff] %v6109_v12  ;;  %4933 = vmatprep.mubr.msk.f32.mxu1 %vm236_vm1, %v6104_v54  ;;  %v6122_v50 = vpop.f32.mrf.mxu0 }
  0xf7   : > { %v6124_v14 = vpop.f32.mrf.mxu1 }
  0xf8   : > { %6827 = vst [vmem:[#allocation12_spill] sm:$0xff] %v6124_v14  ;;  %v6126_v39 = vpop.f32.mrf.mxu0  ;;  %4984 = vmatmul.mubr.msk.f32.gmra.mxu0 %vm236_vm1, %v4165_v4 }
  0xf9   : > { %v6128_v12 = vpop.f32.mrf.mxu1  ;;  %4934 = vmatmul.mubr.msk.f32.gmra.mxu1 %vm236_vm1, %v6119_v46  ;;  %5038 = vmatprep.mubr.msk.f32.mxu0 %vm236_vm1, %v6794_v16 }
  0xfa   : > { %6828 = vst [vmem:[#allocation13_spill] sm:$0xff] %v6128_v12  ;;  %4988 = vmatprep.mubr.msk.f32.mxu1 %vm236_vm1, %v5324_v13  ;;  %v6137_v8 = vpop.f32.mrf.mxu0 }
  0xfb   : > { %v6139_v11 = vpop.f32.mrf.mxu1 }
  0xfc   : > { %6829 = vst [vmem:[#allocation14_spill] sm:$0xff] %v6139_v11  ;;  %v4740_v14 = vpop.f32.mrf.mxu0  ;;  %5039 = vmatmul.mubr.msk.f32.vlgmr.msra.gmra.mxu0 %vm236_vm1, %v6795_v18 }
  0xfd   : > { %v4690_v40 = vpop.f32.mrf.mxu1  ;;  %4989 = vmatmul.mubr.msk.f32.vlgmr.msra.gmra.mxu1 %vm236_vm1, %v5342_v15  ;;  %5041 = vmatprep.mubr.msk.f32.mxu0 %vm236_vm1, %v6796_v20 }
  0xfe   : > { %v733_v4 = vadd.f32 %v4690_v40, %v6007_v41  ;;  %4991 = vmatprep.mubr.msk.f32.mxu1 %vm236_vm1, %v5348_v17  ;;  %v1085_v16 = vpop.f32.mrf.mxu0  ;;  %v4210_v40 = vld [vmem:[%s5279_s7 + $0xa9] sm:$0xff] }
  0xff   : > { %v727_v13 = vpop.f32.mrf.mxu1 }
 0x100   : > { %v6150_v12 = vadd.f32 %v4740_v14, %v733_v4  ;;  %v728_v11 = vadd.f32 %v727_v13, %v6019_v47  ;;  %v4743_v54 = vpop.f32.mrf.mxu0  ;;  %5042 = vmatmul.mubr.msk.f32.gmra.mxu0 %vm236_vm1, %v6797_v22 }
 0x101   : > { %v4693_v46 = vpop.f32.mrf.mxu1  ;;  %4992 = vmatmul.mubr.msk.f32.gmra.mxu1 %vm236_vm1, %v5362_v19  ;;  %5044 = vmatprep.mubr.msk.f32.mxu0 %vm236_vm1, %v6798_v24 }
 0x102   : > { %v6157_v15 = vadd.f32 %v1085_v16, %v728_v11  ;;  %v743_v17 = vadd.f32 %v4693_v46, %v6023_v51  ;;  %4994 = vmatprep.mubr.msk.f32.mxu1 %vm236_vm1, %v5368_v21  ;;  %v1095_v20 = vpop.f32.mrf.mxu0  ;;  %v4211_v16 = vld [vmem:[%s5279_s7 + $0xb1] sm:$0xff] }
 0x103   : > { %v737_v18 = vpop.f32.mrf.mxu1 }
 0x104   : > { %v6164_v41 = vadd.f32 %v4743_v54, %v743_v17  ;;  %v738_v19 = vadd.f32 %v737_v18, %v6035_v59  ;;  %v4746_v14 = vpop.f32.mrf.mxu0  ;;  %5045 = vmatmul.mubr.msk.f32.gmra.mxu0 %vm236_vm1, %v6799_v26  ;;  %v4208_v59 = vld [vmem:[%s5279_s7 + $0x91] sm:$0xff]  ;;  %v4212_v18 = vld [vmem:[%s5279_s7 + $0xc1] sm:$0xff] }
 0x105   : > { %v4696_v47 = vpop.f32.mrf.mxu1  ;;  %4995 = vmatmul.mubr.msk.f32.gmra.mxu1 %vm236_vm1, %v5382_v23  ;;  %5047 = vmatprep.mubr.msk.f32.mxu0 %vm236_vm1, %v6800_v28 }
 0x106   : > { %v6171_v22 = vadd.f32 %v1095_v20, %v738_v19  ;;  %v753_v21 = vadd.f32 %v4696_v47, %v6039_v61  ;;  %4997 = vmatprep.mubr.msk.f32.mxu1 %vm236_vm1, %v5388_v25  ;;  %v1105_v51 = vpop.f32.mrf.mxu0  ;;  %v4209_v61 = vld [vmem:[%s5279_s7 + $0x99] sm:$0xff] }
 0x107   : > { %v747_v24 = vpop.f32.mrf.mxu1 }
 0x108   : > { %v6179_v54 = vadd.f32 %v4746_v14, %v753_v21  ;;  %v748_v23 = vadd.f32 %v747_v24, %v6051_v56  ;;  %v4749_v46 = vpop.f32.mrf.mxu0  ;;  %5048 = vmatmul.mubr.msk.f32.gmra.mxu0 %vm236_vm1, %v6801_v29  ;;  %v4213_v14 = vld [vmem:[%s5279_s7 + $0xc9] sm:$0xff]  ;;  %v4214_v24 = vld [vmem:[%s5279_s7 + $0xd9] sm:$0xff] }
 0x109   : > { %v4699_v26 = vpop.f32.mrf.mxu1  ;;  %4998 = vmatmul.mubr.msk.f32.gmra.mxu1 %vm236_vm1, %v5402_v27  ;;  %5050 = vmatprep.mubr.msk.f32.mxu0 %vm236_vm1, %v6802_v30 }
 0x10a   : > { %v6186_v25 = vadd.f32 %v1105_v51, %v748_v23  ;;  %v763_v28 = vadd.f32 %v4699_v26, %v6055_v2  ;;  %5000 = vmatprep.mubr.msk.f32.mxu1 %vm236_vm1, %v4208_v59  ;;  %v1115_v11 = vpop.f32.mrf.mxu0  ;;  %v4215_v26 = vld [vmem:[%s5279_s7 + $0xe1] sm:$0xff] }
 0x10b   : > { %v757_v56 = vpop.f32.mrf.mxu1 }
 0x10c   : > { %v6194_v4 = vadd.f32 %v4749_v46, %v763_v28  ;;  %v758_v27 = vadd.f32 %v757_v56, %v6067_v52  ;;  %v4752_v13 = vpop.f32.mrf.mxu0  ;;  %5051 = vmatmul.mubr.msk.f32.gmra.mxu0 %vm236_vm1, %v6803_v31  ;;  %v4216_v28 = vld [vmem:[%s5279_s7 + $0xf1] sm:$0xff] }
 0x10d   : > { %v4702_v29 = vpop.f32.mrf.mxu1  ;;  %5001 = vmatmul.mubr.msk.f32.gmra.mxu1 %vm236_vm1, %v4209_v61  ;;  %5053 = vmatprep.mubr.msk.f32.mxu0 %vm236_vm1, %v6804_v32 }
 0x10e   : > { %v6200_v2 = vadd.f32 %v1115_v11, %v758_v27  ;;  %v773_v30 = vadd.f32 %v4702_v29, %v6071_v10  ;;  %5003 = vmatprep.mubr.msk.f32.mxu1 %vm236_vm1, %v4210_v40  ;;  %v1125_v52 = vpop.f32.mrf.mxu0  ;;  %v4217_v40 = vld [vmem:[%s5279_s7 + $0xf9] sm:$0xff]  ;;  %v4218_v29 = vld [vmem:[%s5279_s7 + $0x109] sm:$0xff] }
 0x10f   : > { %v767_v17 = vpop.f32.mrf.mxu1 }
 0x110   : > { %v6208_v20 = vadd.f32 %v4752_v13, %v773_v30  ;;  %v768_v19 = vadd.f32 %v767_v17, %v6083_v48  ;;  %v4755_v47 = vpop.f32.mrf.mxu0  ;;  %5054 = vmatmul.mubr.msk.f32.gmra.mxu0 %vm236_vm1, %v6805_v33  ;;  %v4219_v17 = vld [vmem:[%s5279_s7 + $0x111] sm:$0xff] }
 0x111   : > { %v4705_v31 = vpop.f32.mrf.mxu1  ;;  %5004 = vmatmul.mubr.msk.f32.gmra.mxu1 %vm236_vm1, %v4211_v16  ;;  %5056 = vmatprep.mubr.msk.f32.mxu0 %vm236_vm1, %v6806_v34 }
 0x112   : > { %v6214_v10 = vadd.f32 %v1125_v52, %v768_v19  ;;  %v783_v32 = vadd.f32 %v4705_v31, %v6087_v7  ;;  %5006 = vmatprep.mubr.msk.f32.mxu1 %vm236_vm1, %v4212_v18  ;;  %v1135_v48 = vpop.f32.mrf.mxu0  ;;  %v4220_v18 = vld [vmem:[%s5279_s7 + $0x121] sm:$0xff] }
 0x113   : > { %v777_v21 = vpop.f32.mrf.mxu1 }
 0x114   : > { %v6222_v51 = vadd.f32 %v4755_v47, %v783_v32  ;;  %v778_v59 = vadd.f32 %v777_v21, %v6099_v42  ;;  %v4758_v23 = vpop.f32.mrf.mxu0  ;;  %5057 = vmatmul.mubr.msk.f32.gmra.mxu0 %vm236_vm1, %v6807_v35  ;;  %v4222_v21 = vld [vmem:[%s5279_s7 + $0x139] sm:$0xff] }
 0x115   : > { %v4708_v33 = vpop.f32.mrf.mxu1  ;;  %5007 = vmatmul.mubr.msk.f32.gmra.mxu1 %vm236_vm1, %v4213_v14  ;;  %5059 = vmatprep.mubr.msk.f32.mxu0 %vm236_vm1, %v6808_v36 }
 0x116   : > { %v6228_v7 = vadd.f32 %v1135_v48, %v778_v59  ;;  %v793_v34 = vadd.f32 %v4708_v33, %v6107_v6  ;;  %5009 = vmatprep.mubr.msk.f32.mxu1 %vm236_vm1, %v4214_v24  ;;  %v1145_v42 = vpop.f32.mrf.mxu0  ;;  %v4223_v33 = vld [vmem:[%s5279_s7 + $0x141] sm:$0xff] }
 0x117   : > { %v787_v46 = vpop.f32.mrf.mxu1 }
 0x118   : > { %v6236_v61 = vadd.f32 %v4758_v23, %v793_v34  ;;  %v788_v56 = vadd.f32 %v787_v46, %v6122_v50  ;;  %v4761_v11 = vpop.f32.mrf.mxu0  ;;  %5060 = vmatmul.mubr.msk.f32.gmra.mxu0 %vm236_vm1, %v6809_v44  ;;  %v4224_v34 = vld [vmem:[%s5279_s7 + $0x151] sm:$0xff] }
 0x119   : > { %v4711_v35 = vpop.f32.mrf.mxu1  ;;  %5010 = vmatmul.mubr.msk.f32.gmra.mxu1 %vm236_vm1, %v4215_v26  ;;  %5062 = vmatprep.mubr.msk.f32.mxu0 %vm236_vm1, %v6810_v45  ;;  %v4290_v26 = vld [vmem:[%s5279_s7 + $0x152] sm:$0xff] }
 0x11a   : > { %v6242_v6 = vadd.f32 %v1145_v42, %v788_v56  ;;  %v803_v36 = vadd.f32 %v4711_v35, %v6126_v39  ;;  %5012 = vmatprep.mubr.msk.f32.mxu1 %vm236_vm1, %v4216_v28  ;;  %v1155_v50 = vpop.f32.mrf.mxu0  ;;  %v4225_v56 = vld [vmem:[%s5279_s7 + $0x159] sm:$0xff] }
 0x11b   : > { %v797_v27 = vpop.f32.mrf.mxu1  ;;  %v4291_v35 = vld [vmem:[%s5279_s7 + $0x15a] sm:$0xff] }
 0x11c   : > { %v6250_v13 = vadd.f32 %v4761_v11, %v803_v36  ;;  %v798_v30 = vadd.f32 %v797_v27, %v6137_v8  ;;  %v4764_v16 = vpop.f32.mrf.mxu0  ;;  %5063 = vmatmul.mubr.msk.f32.gmra.mxu0 %vm236_vm1, %v6811_v55  ;;  %v4226_v36 = vld [vmem:[%s5279_s7 + $0x169] sm:$0xff] }
 0x11d   : > { %v4714_v44 = vpop.f32.mrf.mxu1  ;;  %5013 = vmatmul.mubr.msk.f32.gmra.mxu1 %vm236_vm1, %v4217_v40  ;;  %5065 = vmatprep.mubr.msk.f32.mxu0 %vm236_vm1, %v6812_v57  ;;  %v4221_v57 = vld [vmem:[%s5279_s7 + $0x129] sm:$0xff] }
 0x11e   : > { %v6256_v39 = vadd.f32 %v1155_v50, %v798_v30  ;;  %v813_v45 = vadd.f32 %v4714_v44, %v6009_v43  ;;  %5015 = vmatprep.mubr.msk.f32.mxu1 %vm236_vm1, %v4218_v29  ;;  %v1165_v8 = vpop.f32.mrf.mxu0  ;;  %v4292_v40 = vld [vmem:[%s5279_s7 + $0x16a] sm:$0xff] }
 0x11f   : > { %v807_v52 = vpop.f32.mrf.mxu1  ;;  %v4227_v44 = vld [vmem:[%s5279_s7 + $0x171] sm:$0xff] }
 0x120   : > { %v6264_v19 = vadd.f32 %v4764_v16, %v813_v45  ;;  %v808_v31 = vadd.f32 %v807_v52, %v6021_v49  ;;  %v4767_v47 = vpop.f32.mrf.mxu0  ;;  %5066 = vmatmul.mubr.msk.f32.gmra.mxu0 %vm236_vm1, %v6813_v0  ;;  %v4293_v16 = vld [vmem:[%s5279_s7 + $0x172] sm:$0xff]  ;;  %v6830_v52 = vld [vmem:[#allocation6_spill] sm:$0xff] }
 0x121   : > { %v4717_v55 = vpop.f32.mrf.mxu1  ;;  %5016 = vmatmul.mubr.msk.f32.gmra.mxu1 %vm236_vm1, %v4219_v17  ;;  %5068 = vmatprep.mubr.msk.f32.mxu0 %vm236_vm1, %v6814_v62 }
 0x122   : > { %v6270_v43 = vadd.f32 %v1165_v8, %v808_v31  ;;  %v823_v32 = vadd.f32 %v4717_v55, %v6025_v53  ;;  %5018 = vmatprep.mubr.msk.f32.mxu1 %vm236_vm1, %v4220_v18  ;;  %v1175_v49 = vpop.f32.mrf.mxu0  ;;  %v6831_v55 = vld [vmem:[#allocation7_spill] sm:$0xff] }
 0x123   : > { %v817_v14 = vpop.f32.mrf.mxu1 }
 0x124   : > { %v6278_v48 = vadd.f32 %v4767_v47, %v823_v32  ;;  %v818_v0 = vadd.f32 %v817_v14, %v6037_v60  ;;  %v4770_v59 = vpop.f32.mrf.mxu0  ;;  %5069 = vmatmul.mubr.msk.f32.gmra.mxu0 %vm236_vm1, %v6815_v5  ;;  %v6832_v32 = vld [vmem:[#allocation35_spill] sm:$0xff] }
 0x125   : > { %v4720_v24 = vpop.f32.mrf.mxu1  ;;  %5019 = vmatmul.mubr.msk.f32.gmra.mxu1 %vm236_vm1, %v4221_v57  ;;  %5071 = vmatprep.mubr.msk.f32.mxu0 %vm236_vm1, %v6816_v58  ;;  %v6833_v57 = vld [vmem:[#allocation9_spill] sm:$0xff] }
 0x126   : > { %v6284_v53 = vadd.f32 %v1175_v49, %v818_v0  ;;  %v833_v62 = vadd.f32 %v4720_v24, %v6041_v63  ;;  %5021 = vmatprep.mubr.msk.f32.mxu1 %vm236_vm1, %v4222_v21  ;;  %v1185_v23 = vpop.f32.mrf.mxu0  ;;  %v4230_v21 = vld [vmem:[%s5279_s7 + $0x199] sm:$0xff] }
 0x127   : > { %v827_v60 = vpop.f32.mrf.mxu1  ;;  %v4296_v0 = vld [vmem:[%s5279_s7 + $0x19a] sm:$0xff] }
 0x128   : > { %v6293_v46 = vadd.f32 %v4770_v59, %v833_v62  ;;  %v828_v5 = vadd.f32 %v827_v60, %v6053_v1  ;;  %v4773_v63 = vpop.f32.mrf.mxu0  ;;  %5072 = vmatmul.mubr.msk.f32.gmra.mxu0 %vm236_vm1, %v6817_v38  ;;  %v6834_v59 = vld [vmem:[#allocation8_spill] sm:$0xff] }
 0x129   : > { %v4723_v42 = vpop.f32.mrf.mxu1  ;;  %5022 = vmatmul.mubr.msk.f32.gmra.mxu1 %vm236_vm1, %v4223_v33  ;;  %5074 = vmatprep.mubr.msk.f32.mxu0 %vm236_vm1, %v4290_v26 }
 0x12a   : > { %v6299_v28 = vadd.f32 %v1185_v23, %v828_v5  ;;  %v843_v58 = vadd.f32 %v4723_v42, %v6057_v3  ;;  %5024 = vmatprep.mubr.msk.f32.mxu1 %vm236_vm1, %v4224_v34  ;;  %v1195_v11 = vpop.f32.mrf.mxu0  ;;  %v6835_v23 = vld [vmem:[#allocation5_spill] sm:$0xff]  ;;  %v6836_v34 = vld [vmem:[#allocation11_spill] sm:$0xff]  ;;  %v6837_v5 = vld [vmem:[#allocation10_spill] sm:$0xff] }
 0x12b   : > { %v837_v1 = vpop.f32.mrf.mxu1 }
 0x12c   : > { %v6308_v27 = vadd.f32 %v4773_v63, %v843_v58  ;;  %v838_v38 = vadd.f32 %v837_v1, %v6069_v9  ;;  %v4776_v29 = vpop.f32.mrf.mxu0  ;;  %5075 = vmatmul.mubr.msk.f32.gmra.mxu0 %vm236_vm1, %v4291_v35  ;;  %v4231_v63 = vld [vmem:[%s5279_s7 + $0x1a1] sm:$0xff] }
 0x12d   : > { %v4726_v50 = vpop.f32.mrf.mxu1  ;;  %5025 = vmatmul.mubr.msk.f32.gmra.mxu1 %vm236_vm1, %v4225_v56  ;;  %5077 = vmatprep.mubr.msk.f32.mxu0 %vm236_vm1, %v4292_v40  ;;  %v4297_v58 = vld [vmem:[%s5279_s7 + $0x1a2] sm:$0xff]  ;;  %s3770_s7 = sshll.u32 %s163_s6, 4  ;;  %s6657_s7 = int_to_ptr.vmem [resolvable:$true] %s3770_s7 }
 0x12e   : > { %v6313_v3 = vadd.f32 %v1195_v11, %v838_v38  ;;  %v853_v30 = vadd.f32 %v4726_v50, %v6073_v37  ;;  %5027 = vmatprep.mubr.msk.f32.mxu1 %vm236_vm1, %v4226_v36  ;;  %v1205_v9 = vpop.f32.mrf.mxu0  ;;  %v6838_v11 = vld [vmem:[#allocation12_spill] sm:$0xff]  ;;  %s5128_s19 = scalar_lea.vmem %s6657_s7, 256  ;;  %p5135_p0 = scmp.lt.s32.totalorder %s6657_s7, %s5133_s24 }
 0x12f   : > { %v847_v45 = vpop.f32.mrf.mxu1  ;;  %p5129_p11 = scmp.ne.s32.totalorder %s6657_s7, %s5128_s19  ;;  %p5136_p1 = scmp.lt.s32.totalorder %s5134_s16, %s5128_s19 }
 0x130   : > { %v6320_v17 = vadd.f32 %v4776_v29, %v853_v30  ;;  %v848_v8 = vadd.f32 %v847_v45, %v6830_v52  ;;  %v4779_v31 = vpop.f32.mrf.mxu0  ;;  %5078 = vmatmul.mubr.msk.f32.gmra.mxu0 %vm236_vm1, %v4293_v16  ;;  %v6839_v29 = vld [vmem:[#allocation13_spill] sm:$0xff] }
 0x131   : > { %v4729_v18 = vpop.f32.mrf.mxu1  ;;  %5028 = vmatmul.mubr.msk.f32.gmra.mxu1 %vm236_vm1, %v4227_v44  ;;  %5080 = vmatprep.mubr.msk.f32.mxu0 %vm236_vm1, %v6833_v57  ;;  %p5130_p12 = pnand %p5129_p11, %p5249_p5  ;;  %p5137_p2 = por %p5136_p1, %p5135_p0 }
 0x132   : > { %v6325_v37 = vadd.f32 %v1205_v9, %v848_v8  ;;  %v863_v47 = vadd.f32 %v4729_v18, %v6831_v55  ;;  %5030 = vmatprep.mubr.msk.f32.mxu1 %vm236_vm1, %v6832_v32  ;;  %v1215_v49 = vpop.f32.mrf.mxu0  ;;  %v6840_v9 = vld [vmem:[#allocation14_spill] sm:$0xff] }
 0x133   : > { %v857_v14 = vpop.f32.mrf.mxu1  ;;  %p5131_p13 = pneg %p5130_p12 }
 0x134   : > { %v6334_v24 = vadd.f32 %v4779_v31, %v863_v47  ;;  %v858_v62 = vadd.f32 %v857_v14, %v6834_v59  ;;  %v4782_v60 = vpop.f32.mrf.mxu0  ;;  %5081 = vmatmul.mubr.msk.f32.gmra.mxu0 %vm236_vm1, %v6836_v34 }
 0x135   : > { %v4732_v33 = vpop.f32.mrf.mxu1  ;;  %5031 = vmatmul.mubr.msk.f32.gmra.mxu1 %vm236_vm1, %v6835_v23  ;;  %5083 = vmatprep.mubr.msk.f32.mxu0 %vm236_vm1, %v4296_v0  ;;  %p5138_p3 = pnand %p5137_p2, %p5131_p13 }
 0x136   : > { %v6341_v26 = vadd.f32 %v1215_v49, %v858_v62  ;;  %v873_v42 = vadd.f32 %v4732_v33, %v6837_v5  ;;  %5033 = vmatprep.mubr.msk.f32.mxu1 %vm236_vm1, %v4230_v21  ;;  %v1225_v35 = vpop.f32.mrf.mxu0 }
 0x137   : > { %v867_v56 = vpop.f32.mrf.mxu1 }
 0x138   : > { %v6348_v1 = vadd.f32 %v4782_v60, %v873_v42  ;;  %v868_v36 = vadd.f32 %v867_v56, %v6838_v11  ;;  %v4785_v38 = vpop.f32.mrf.mxu0  ;;  %5084 = vmatmul.mubr.msk.f32.gmra.mxu0 %vm236_vm1, %v4297_v58 }
 0x139   : > { %v4735_v40 = vpop.f32.mrf.mxu1  ;;  %5034 = vmatmul.mubr.msk.f32.gmra.mxu1 %vm236_vm1, %v4231_v63 }
 0x13a   : > { %v6353_v50 = vadd.f32 %v1225_v35, %v868_v36  ;;  %v883_v30 = vadd.f32 %v4735_v40, %v6839_v29  ;;  %v1235_v16 = vpop.f32.mrf.mxu0 }
 0x13b   : > { %v877_v44 = vpop.f32.mrf.mxu1 }
 0x13c   : > { %v6356_v45 = vadd.f32 %v4785_v38, %v883_v30  ;;  %v878_v52 = vadd.f32 %v877_v44, %v6840_v9  ;;  %v4840_v18 = vpop.f32.mrf.mxu0 }
 0x13d   : > { %v4790_v8 = vpop.f32.mrf.mxu1 }
 0x13e   : > { %v6359_v31 = vadd.f32 %v1235_v16, %v878_v52  ;;  %v1636_v55 = vadd.f32 %v4790_v8, %v6150_v12  ;;  %v1866_v32 = vpop.f32.mrf.mxu0 }
 0x13f   : > { %v1476_v47 = vpop.f32.mrf.mxu1 }
 0x140   : > { %v6362_v57 = vadd.f32 %v4840_v18, %v1636_v55  ;;  %v1635_v14 = vadd.f32 %v1476_v47, %v6157_v15  ;;  %v4843_v21 = vpop.f32.mrf.mxu0 }
 0x141   : > { %v4793_v49 = vpop.f32.mrf.mxu1 }
 0x142   : > { %v6365_v0 = vadd.f32 %v1866_v32, %v1635_v14  ;;  %v1638_v59 = vadd.f32 %v4793_v49, %v6164_v41  ;;  %v1876_v33 = vpop.f32.mrf.mxu0 }
 0x143   : > { %v1486_v62 = vpop.f32.mrf.mxu1 }
 0x144   : > { %v6368_v60 = vadd.f32 %v4843_v21, %v1638_v59  ;;  %v1637_v23 = vadd.f32 %v1486_v62, %v6171_v22  ;;  %v4846_v12 = vpop.f32.mrf.mxu0 }
 0x145   : > { %v4796_v34 = vpop.f32.mrf.mxu1 }
 0x146   : > { %v6371_v5 = vadd.f32 %v1876_v33, %v1637_v23  ;;  %v1640_v42 = vadd.f32 %v4796_v34, %v6179_v54  ;;  %v1886_v15 = vpop.f32.mrf.mxu0 }
 0x147   : > { %v1496_v63 = vpop.f32.mrf.mxu1 }
 0x148   : > { %v6374_v58 = vadd.f32 %v4846_v12, %v1640_v42  ;;  %v1639_v56 = vadd.f32 %v1496_v63, %v6186_v25  ;;  %v4849_v41 = vpop.f32.mrf.mxu0 }
 0x149   : > { %v4799_v35 = vpop.f32.mrf.mxu1 }
 0x14a   : > { %v6377_v11 = vadd.f32 %v1886_v15, %v1639_v56  ;;  %v1642_v36 = vadd.f32 %v4799_v35, %v6194_v4  ;;  %v1896_v22 = vpop.f32.mrf.mxu0 }
 0x14b   : > { %v1506_v40 = vpop.f32.mrf.mxu1 }
 0x14c   : > { %v6380_v38 = vadd.f32 %v4849_v41, %v1642_v36  ;;  %v1641_v29 = vadd.f32 %v1506_v40, %v6200_v2  ;;  %v4852_v54 = vpop.f32.mrf.mxu0 }
 0x14d   : > { %v4802_v30 = vpop.f32.mrf.mxu1 }
 0x14e   : > { %v6383_v44 = vadd.f32 %v1896_v22, %v1641_v29  ;;  %v1644_v16 = vadd.f32 %v4802_v30, %v6208_v20  ;;  %v1906_v25 = vpop.f32.mrf.mxu0 }
 0x14f   : > { %v1516_v9 = vpop.f32.mrf.mxu1 }
 0x150   : > { %v6386_v52 = vadd.f32 %v4852_v54, %v1644_v16  ;;  %v1643_v8 = vadd.f32 %v1516_v9, %v6214_v10  ;;  %v4855_v4 = vpop.f32.mrf.mxu0 }
 0x151   : > { %v4805_v18 = vpop.f32.mrf.mxu1 }
 0x152   : > { %v6389_v55 = vadd.f32 %v1906_v25, %v1643_v8  ;;  %v1646_v47 = vadd.f32 %v4805_v18, %v6222_v51  ;;  %v1916_v2 = vpop.f32.mrf.mxu0 }
 0x153   : > { %v1526_v32 = vpop.f32.mrf.mxu1 }
 0x154   : > { %v6392_v14 = vadd.f32 %v4855_v4, %v1646_v47  ;;  %v1645_v49 = vadd.f32 %v1526_v32, %v6228_v7  ;;  %v4858_v20 = vpop.f32.mrf.mxu0 }
 0x155   : > { %v4808_v21 = vpop.f32.mrf.mxu1 }
 0x156   : > { %v6395_v59 = vadd.f32 %v1916_v2, %v1645_v49  ;;  %v1648_v62 = vadd.f32 %v4808_v21, %v6236_v61  ;;  %v1926_v10 = vpop.f32.mrf.mxu0 }
 0x157   : > { %v1536_v33 = vpop.f32.mrf.mxu1 }
 0x158   : > { %v6398_v23 = vadd.f32 %v4858_v20, %v1648_v62  ;;  %v1647_v34 = vadd.f32 %v1536_v33, %v6242_v6  ;;  %v4861_v51 = vpop.f32.mrf.mxu0 }
 0x159   : > { %v4811_v12 = vpop.f32.mrf.mxu1 }
 0x15a   : > { %v6401_v42 = vadd.f32 %v1926_v10, %v1647_v34  ;;  %v1650_v63 = vadd.f32 %v4811_v12, %v6250_v13  ;;  %v1936_v7 = vpop.f32.mrf.mxu0 }
 0x15b   : > { %v1546_v15 = vpop.f32.mrf.mxu1 }
 0x15c   : > { %v6404_v56 = vadd.f32 %v4861_v51, %v1650_v63  ;;  %v1649_v35 = vadd.f32 %v1546_v15, %v6256_v39  ;;  %v4864_v61 = vpop.f32.mrf.mxu0 }
 0x15d   : > { %v4814_v41 = vpop.f32.mrf.mxu1 }
 0x15e   : > { %v6407_v36 = vadd.f32 %v1936_v7, %v1649_v35  ;;  %v1652_v40 = vadd.f32 %v4814_v41, %v6264_v19  ;;  %v1946_v6 = vpop.f32.mrf.mxu0 }
 0x15f   : > { %v1556_v22 = vpop.f32.mrf.mxu1 }
 0x160   : > { %v6410_v29 = vadd.f32 %v4864_v61, %v1652_v40  ;;  %v1651_v30 = vadd.f32 %v1556_v22, %v6270_v43  ;;  %v4867_v13 = vpop.f32.mrf.mxu0 }
 0x161   : > { %v4817_v54 = vpop.f32.mrf.mxu1 }
 0x162   : > { %v6413_v16 = vadd.f32 %v1946_v6, %v1651_v30  ;;  %v1654_v9 = vadd.f32 %v4817_v54, %v6278_v48  ;;  %v1956_v39 = vpop.f32.mrf.mxu0 }
 0x163   : > { %v1566_v25 = vpop.f32.mrf.mxu1 }
 0x164   : > { %v6416_v8 = vadd.f32 %v4867_v13, %v1654_v9  ;;  %v1653_v18 = vadd.f32 %v1566_v25, %v6284_v53  ;;  %v4870_v19 = vpop.f32.mrf.mxu0 }
 0x165   : > { %v4820_v4 = vpop.f32.mrf.mxu1 }
 0x166   : > { %v6419_v47 = vadd.f32 %v1956_v39, %v1653_v18  ;;  %v1656_v32 = vadd.f32 %v4820_v4, %v6293_v46  ;;  %v1966_v43 = vpop.f32.mrf.mxu0 }
 0x167   : > { %v1576_v2 = vpop.f32.mrf.mxu1 }
 0x168   : > { %v6422_v49 = vadd.f32 %v4870_v19, %v1656_v32  ;;  %v1655_v21 = vadd.f32 %v1576_v2, %v6299_v28  ;;  %v4873_v48 = vpop.f32.mrf.mxu0 }
 0x169   : > { %v4823_v20 = vpop.f32.mrf.mxu1 }
 0x16a   : > { %v6425_v62 = vadd.f32 %v1966_v43, %v1655_v21  ;;  %v1658_v33 = vadd.f32 %v4823_v20, %v6308_v27  ;;  %v1976_v53 = vpop.f32.mrf.mxu0 }
 0x16b   : > { %v1586_v10 = vpop.f32.mrf.mxu1 }
 0x16c   : > { %v6428_v34 = vadd.f32 %v4873_v48, %v1658_v33  ;;  %v1657_v12 = vadd.f32 %v1586_v10, %v6313_v3  ;;  %v4876_v46 = vpop.f32.mrf.mxu0 }
 0x16d   : > { %v4826_v51 = vpop.f32.mrf.mxu1 }
 0x16e   : > { %v6431_v63 = vadd.f32 %v1976_v53, %v1657_v12  ;;  %v1660_v15 = vadd.f32 %v4826_v51, %v6320_v17  ;;  %v1986_v28 = vpop.f32.mrf.mxu0 }
 0x16f   : > { %v1596_v7 = vpop.f32.mrf.mxu1 }
 0x170   : > { %v6434_v35 = vadd.f32 %v4876_v46, %v1660_v15  ;;  %v1659_v41 = vadd.f32 %v1596_v7, %v6325_v37  ;;  %v4879_v27 = vpop.f32.mrf.mxu0 }
 0x171   : > { %v4829_v61 = vpop.f32.mrf.mxu1 }
 0x172   : > { %v6437_v40 = vadd.f32 %v1986_v28, %v1659_v41  ;;  %v1662_v22 = vadd.f32 %v4829_v61, %v6334_v24  ;;  %v1996_v3 = vpop.f32.mrf.mxu0 }
 0x173   : > { %v1606_v6 = vpop.f32.mrf.mxu1 }
 0x174   : > { %v6440_v30 = vadd.f32 %v4879_v27, %v1662_v22  ;;  %v1661_v54 = vadd.f32 %v1606_v6, %v6341_v26  ;;  %v4882_v17 = vpop.f32.mrf.mxu0 }
 0x175   : > { %v4832_v13 = vpop.f32.mrf.mxu1 }
 0x176   : > { %v6443_v9 = vadd.f32 %v1996_v3, %v1661_v54  ;;  %v1664_v25 = vadd.f32 %v4832_v13, %v6348_v1  ;;  %v2006_v37 = vpop.f32.mrf.mxu0 }
 0x177   : > { %v1616_v39 = vpop.f32.mrf.mxu1 }
 0x178   : > { %v6446_v18 = vadd.f32 %v4882_v17, %v1664_v25  ;;  %v1663_v4 = vadd.f32 %v1616_v39, %v6353_v50  ;;  %v4885_v24 = vpop.f32.mrf.mxu0 }
 0x179   : > { %v4835_v19 = vpop.f32.mrf.mxu1 }
 0x17a   : > { %v6449_v32 = vadd.f32 %v2006_v37, %v1663_v4  ;;  %v1666_v2 = vadd.f32 %v4835_v19, %v6356_v45  ;;  %v2016_v26 = vpop.f32.mrf.mxu0 }
 0x17b   : > { %v1626_v43 = vpop.f32.mrf.mxu1 }
 0x17c   : > { %v6452_v21 = vadd.f32 %v4885_v24, %v1666_v2  ;;  %v1665_v20 = vadd.f32 %v1626_v43, %v6359_v31  ;;  %v4940_v1 = vpop.f32.mrf.mxu0 }
 0x17d   : > { %v4890_v48 = vpop.f32.mrf.mxu1 }
 0x17e   : > { %v6455_v33 = vadd.f32 %v2016_v26, %v1665_v20  ;;  %v2416_v10 = vadd.f32 %v4890_v48, %v6362_v57  ;;  %v6460_v50 = vpop.f32.mrf.mxu0 }
 0x17f   : > { %v6458_v53 = vpop.f32.mrf.mxu1 }
 0x180   : > { %v6462_v12 = vadd.f32 %v4940_v1, %v2416_v10  ;;  %v4943_v45 = vpop.f32.mrf.mxu0 }
 0x181   : > { %v4893_v51 = vpop.f32.mrf.mxu1 }
 0x182   : > { %v2418_v46 = vadd.f32 %v4893_v51, %v6368_v60  ;;  %v2657_v7 = vpop.f32.mrf.mxu0 }
 0x183   : > { %v2266_v15 = vpop.f32.mrf.mxu1 }
 0x184   : > { %v6465_v28 = vadd.f32 %v4943_v45, %v2418_v46  ;;  %v2417_v31 = vadd.f32 %v2266_v15, %v6371_v5  ;;  %v4946_v61 = vpop.f32.mrf.mxu0 }
 0x185   : > { %v4896_v41 = vpop.f32.mrf.mxu1 }
 0x186   : > { %v6468_v27 = vadd.f32 %v2657_v7, %v2417_v31  ;;  %v2420_v57 = vadd.f32 %v4896_v41, %v6374_v58  ;;  %v2667_v6 = vpop.f32.mrf.mxu0 }
 0x187   : > { %v2276_v22 = vpop.f32.mrf.mxu1 }
 0x188   : > { %v6471_v3 = vadd.f32 %v4946_v61, %v2420_v57  ;;  %v2419_v54 = vadd.f32 %v2276_v22, %v6377_v11  ;;  %v4949_v60 = vpop.f32.mrf.mxu0 }
 0x189   : > { %v4899_v13 = vpop.f32.mrf.mxu1 }
 0x18a   : > { %v6474_v17 = vadd.f32 %v2667_v6, %v2419_v54  ;;  %v2422_v25 = vadd.f32 %v4899_v13, %v6380_v38  ;;  %v2677_v5 = vpop.f32.mrf.mxu0 }
 0x18b   : > { %v2286_v39 = vpop.f32.mrf.mxu1 }
 0x18c   : > { %v6477_v37 = vadd.f32 %v4949_v60, %v2422_v25  ;;  %v2421_v4 = vadd.f32 %v2286_v39, %v6383_v44  ;;  %v4952_v58 = vpop.f32.mrf.mxu0 }
 0x18d   : > { %v4902_v19 = vpop.f32.mrf.mxu1 }
 0x18e   : > { %v6480_v24 = vadd.f32 %v2677_v5, %v2421_v4  ;;  %v2424_v2 = vadd.f32 %v4902_v19, %v6386_v52  ;;  %v2687_v11 = vpop.f32.mrf.mxu0 }
 0x18f   : > { %v2296_v43 = vpop.f32.mrf.mxu1 }
 0x190   : > { %v6483_v26 = vadd.f32 %v4952_v58, %v2424_v2  ;;  %v2423_v20 = vadd.f32 %v2296_v43, %v6389_v55  ;;  %v4955_v38 = vpop.f32.mrf.mxu0 }
 0x191   : > { %v4905_v48 = vpop.f32.mrf.mxu1 }
 0x192   : > { %v6486_v1 = vadd.f32 %v2687_v11, %v2423_v20  ;;  %v2426_v10 = vadd.f32 %v4905_v48, %v6392_v14  ;;  %v2697_v44 = vpop.f32.mrf.mxu0 }
 0x193   : > { %v2306_v51 = vpop.f32.mrf.mxu1 }
 0x194   : > { %v6489_v45 = vadd.f32 %v4955_v38, %v2426_v10  ;;  %v2425_v46 = vadd.f32 %v2306_v51, %v6395_v59  ;;  %v4958_v52 = vpop.f32.mrf.mxu0 }
 0x195   : > { %v4908_v15 = vpop.f32.mrf.mxu1 }
 0x196   : > { %v6492_v7 = vadd.f32 %v2697_v44, %v2425_v46  ;;  %v2428_v31 = vadd.f32 %v4908_v15, %v6398_v23  ;;  %v2707_v55 = vpop.f32.mrf.mxu0 }
 0x197   : > { %v2316_v41 = vpop.f32.mrf.mxu1 }
 0x198   : > { %v6495_v61 = vadd.f32 %v4958_v52, %v2428_v31  ;;  %v2427_v57 = vadd.f32 %v2316_v41, %v6401_v42  ;;  %v4961_v14 = vpop.f32.mrf.mxu0 }
 0x199   : > { %v4911_v22 = vpop.f32.mrf.mxu1 }
 0x19a   : > { %v6498_v6 = vadd.f32 %v2707_v55, %v2427_v57  ;;  %v2430_v54 = vadd.f32 %v4911_v22, %v6404_v56  ;;  %v2717_v59 = vpop.f32.mrf.mxu0 }
 0x19b   : > { %v2326_v13 = vpop.f32.mrf.mxu1 }
 0x19c   : > { %v6501_v60 = vadd.f32 %v4961_v14, %v2430_v54  ;;  %v2429_v25 = vadd.f32 %v2326_v13, %v6407_v36  ;;  %v4964_v23 = vpop.f32.mrf.mxu0 }
 0x19d   : > { %v4914_v39 = vpop.f32.mrf.mxu1 }
 0x19e   : > { %v6504_v5 = vadd.f32 %v2717_v59, %v2429_v25  ;;  %v2432_v4 = vadd.f32 %v4914_v39, %v6410_v29  ;;  %v6509_v42 = vpop.f32.mrf.mxu0 }
 0x19f   : > { %v6507_v19 = vpop.f32.mrf.mxu1 }
 0x1a0   : > { %v6511_v58 = vadd.f32 %v4964_v23, %v2432_v4  ;;  %v4967_v56 = vpop.f32.mrf.mxu0 }
 0x1a1   : > { %v4917_v2 = vpop.f32.mrf.mxu1 }
 0x1a2   : > { %v2434_v43 = vadd.f32 %v4917_v2, %v6416_v8  ;;  %v2737_v20 = vpop.f32.mrf.mxu0 }
 0x1a3   : > { %v2346_v11 = vpop.f32.mrf.mxu1 }
 0x1a4   : > { %v6514_v48 = vadd.f32 %v4967_v56, %v2434_v43  ;;  %v2433_v36 = vadd.f32 %v2346_v11, %v6419_v47  ;;  %v4970_v10 = vpop.f32.mrf.mxu0 }
 0x1a5   : > { %v4920_v38 = vpop.f32.mrf.mxu1 }
 0x1a6   : > { %v6517_v51 = vadd.f32 %v2737_v20, %v2433_v36  ;;  %v2436_v29 = vadd.f32 %v4920_v38, %v6422_v49  ;;  %v2747_v46 = vpop.f32.mrf.mxu0 }
 0x1a7   : > { %v2356_v44 = vpop.f32.mrf.mxu1 }
 0x1a8   : > { %v6520_v15 = vadd.f32 %v4970_v10, %v2436_v29  ;;  %v2435_v52 = vadd.f32 %v2356_v44, %v6425_v62  ;;  %v4973_v8 = vpop.f32.mrf.mxu0 }
 0x1a9   : > { %v4923_v31 = vpop.f32.mrf.mxu1 }
 0x1aa   : > { %v6523_v41 = vadd.f32 %v2747_v46, %v2435_v52  ;;  %v2438_v55 = vadd.f32 %v4923_v31, %v6428_v34  ;;  %v2757_v47 = vpop.f32.mrf.mxu0  ;;  %v2415_v31 = vadd.f32 %v6458_v53, %v6365_v0 }
 0x1ab   : > { %v2366_v57 = vpop.f32.mrf.mxu1 }
 0x1ac   : > { %v6526_v22 = vadd.f32 %v4973_v8, %v2438_v55  ;;  %v2437_v14 = vadd.f32 %v2366_v57, %v6431_v63  ;;  %v4976_v49 = vpop.f32.mrf.mxu0 }
 0x1ad   : > { %v4926_v54 = vpop.f32.mrf.mxu1 }
 0x1ae   : > { %v6529_v13 = vadd.f32 %v2757_v47, %v2437_v14  ;;  %v2440_v59 = vadd.f32 %v4926_v54, %v6434_v35  ;;  %v2767_v62 = vpop.f32.mrf.mxu0 }
 0x1af   : > { %v2376_v25 = vpop.f32.mrf.mxu1 }
 0x1b0   : > { %v6532_v39 = vadd.f32 %v4976_v49, %v2440_v59  ;;  %v2439_v23 = vadd.f32 %v2376_v25, %v6437_v40  ;;  %v4979_v34 = vpop.f32.mrf.mxu0  ;;  %v2806_v49 = vadd.f32 %v6460_v50, %v2415_v31 }
 0x1b1   : > { %v4929_v4 = vpop.f32.mrf.mxu1 }
 0x1b2   : > { %v6535_v2 = vadd.f32 %v2767_v62, %v2439_v23  ;;  %v2442_v56 = vadd.f32 %v4929_v4, %v6440_v30  ;;  %v2777_v63 = vpop.f32.mrf.mxu0 }
 0x1b3   : > { %v2386_v43 = vpop.f32.mrf.mxu1 }
 0x1b4   : > { %v6538_v11 = vadd.f32 %v4979_v34, %v2442_v56  ;;  %v2441_v20 = vadd.f32 %v2386_v43, %v6443_v9  ;;  %v4982_v35 = vpop.f32.mrf.mxu0 }
 0x1b5   : > { %v4932_v36 = vpop.f32.mrf.mxu1 }
 0x1b6   : > { %v6541_v38 = vadd.f32 %v2777_v63, %v2441_v20  ;;  %v2444_v10 = vadd.f32 %v4932_v36, %v6446_v18  ;;  %v2787_v40 = vpop.f32.mrf.mxu0 }
 0x1b7   : > { %v2396_v29 = vpop.f32.mrf.mxu1 }
 0x1b8   : > { %v6544_v44 = vadd.f32 %v4982_v35, %v2444_v10  ;;  %v2443_v46 = vadd.f32 %v2396_v29, %v6449_v32  ;;  %v4985_v30 = vpop.f32.mrf.mxu0 }
 0x1b9   : > { %v4935_v52 = vpop.f32.mrf.mxu1 }
 0x1ba   : > { %v6549_v8 = vadd.f32 %v2787_v40, %v2443_v46  ;;  %v2446_v9 = vadd.f32 %v4935_v52, %v6452_v21  ;;  %v2797_v57 = vpop.f32.mrf.mxu0 }
 0x1bb   : > { %v2406_v55 = vpop.f32.mrf.mxu1 }
 0x1bc   : > { %v6552_v47 = vadd.f32 %v4985_v30, %v2446_v9  ;;  %v2445_v18 = vadd.f32 %v2406_v55, %v6455_v33  ;;  %v5040_v54 = vpop.f32.mrf.mxu0  ;;  %v6562_v33 = vld [vmem:[%s6697_s2] ss:$0 sm:$0xff] }
 0x1bd   : > { %v4990_v14 = vpop.f32.mrf.mxu1 }
 0x1be   : > { %v6556_v32 = vadd.f32 %v2797_v57, %v2445_v18  ;;  %v3197_v59 = vadd.f32 %v4990_v14, %v6462_v12  ;;  %v3427_v0 = vpop.f32.mrf.mxu0 }
 0x1bf   : > { %v3037_v25 = vpop.f32.mrf.mxu1 }
 0x1c0   : > { %v3196_v53 = vadd.f32 %v3037_v25, %v2806_v49  ;;  %v5043_v23 = vpop.f32.mrf.mxu0  ;;  %v3587_v21 = vadd.f32 %v5040_v54, %v3197_v59 }
 0x1c1   : > { %v4993_v62 = vpop.f32.mrf.mxu1 }
 0x1c2   : > { %v3586_v4 = vadd.f32 %v3427_v0, %v3196_v53  ;;  %v3437_v56 = vpop.f32.mrf.mxu0  ;;  %v3199_v20 = vadd.f32 %v4993_v62, %v6465_v28  ;;  %v3626_v10 = vadd.f32 %v6562_v33, %v3587_v21 }
 0x1c3   : > { %v3047_v34 = vpop.f32.mrf.mxu1 }
 0x1c4   : > { %v3198_v50 = vadd.f32 %v3047_v34, %v6468_v27  ;;  %v3625_v43 = vadd.f32 %v6562_v33, %v3586_v4  ;;  %v5046_v12 = vpop.f32.mrf.mxu0  ;;  %v3589_v30 = vadd.f32 %v5043_v23, %v3199_v20  ;;  %v3658_v9 = vmax.f32 %v3626_v10, 0.0 }
 0x1c5   : > { %v4996_v63 = vpop.f32.mrf.mxu1 }
 0x1c6   : > { %v3588_v36 = vadd.f32 %v3437_v56, %v3198_v50  ;;  %v3657_v35 = vmax.f32 %v3625_v43, 0.0  ;;  %v3447_v40 = vpop.f32.mrf.mxu0  ;;  %v3201_v14 = vadd.f32 %v4996_v63, %v6471_v3  ;;  %v3628_v59 = vadd.f32 %v6562_v33, %v3589_v30 }
 0x1c7   : > { %v3057_v29 = vpop.f32.mrf.mxu1 }
 0x1c8   : > { %3689 = vxpose.xlu0.b32.start [1/16] (narrow) %v3657_v35, 8  ;;  %v5049_v52 = vpop.f32.mrf.mxu0  ;;  %v3200_v31 = vadd.f32 %v3057_v29, %v6474_v17  ;;  %v3627_v27 = vadd.f32 %v6562_v33, %v3588_v36  ;;  %v3591_v17 = vadd.f32 %v5046_v12, %v3201_v14  ;;  %v3660_v21 = vmax.f32 %v3628_v59, 0.0 }
 0x1c9   : > { %v4999_v46 = vpop.f32.mrf.mxu1 }
 0x1ca   : > { %v3457_v57 = vpop.f32.mrf.mxu0  ;;  %v3590_v54 = vadd.f32 %v3447_v40, %v3200_v31  ;;  %v3659_v49 = vmax.f32 %v3627_v27, 0.0  ;;  %v3203_v43 = vadd.f32 %v4999_v46, %v6477_v37  ;;  %v3630_v36 = vadd.f32 %v6562_v33, %v3591_v17 }
 0x1cb   : > { %v3067_v55 = vpop.f32.mrf.mxu1 }
 0x1cc   : > { %3690 = vxpose.xlu0.b32.cont [2/16] (narrow) %v3658_v9, 8  ;;  %v5052_v28 = vpop.f32.mrf.mxu0  ;;  %v3202_v23 = vadd.f32 %v3067_v55, %v6480_v24  ;;  %v3629_v4 = vadd.f32 %v6562_v33, %v3590_v54  ;;  %v2431_v24 = vadd.f32 %v6507_v19, %v6413_v16  ;;  %v3593_v40 = vadd.f32 %v5049_v52, %v3203_v43 }
 0x1cd   : > { %v5002_v18 = vpop.f32.mrf.mxu1  ;;  %v3662_v31 = vmax.f32 %v3630_v36, 0.0 }
 0x1ce   : > { %v3467_v0 = vpop.f32.mrf.mxu0  ;;  %v3592_v63 = vadd.f32 %v3457_v57, %v3202_v23  ;;  %v3661_v20 = vmax.f32 %v3629_v4, 0.0  ;;  %v2822_v27 = vadd.f32 %v6509_v42, %v2431_v24  ;;  %v3205_v55 = vadd.f32 %v5002_v18, %v6483_v26 }
 0x1cf   : > { %v3077_v25 = vpop.f32.mrf.mxu1 }
 0x1d0   : > { %3691 = vxpose.xlu0.b32.cont [3/16] (narrow) %v3659_v49, 8  ;;  %v6572_v62 = vpop.f32.mrf.mxu0  ;;  %v3204_v30 = vadd.f32 %v3077_v25, %v6486_v1  ;;  %v3631_v37 = vadd.f32 %v6562_v33, %v3592_v63  ;;  %v3632_v1 = vadd.f32 %v6562_v33, %v3593_v40  ;;  %v3595_v25 = vadd.f32 %v5052_v28, %v3205_v55 }
 0x1d1   : > { %v5005_v53 = vpop.f32.mrf.mxu1 }
 0x1d2   : > { %v3477_v56 = vpop.f32.mrf.mxu0  ;;  %v3594_v57 = vadd.f32 %v3467_v0, %v3204_v30  ;;  %v3663_v52 = vmax.f32 %v3631_v37, 0.0  ;;  %v3664_v26 = vmax.f32 %v3632_v1, 0.0  ;;  %v3634_v24 = vadd.f32 %v6562_v33, %v3595_v25 }
 0x1d3   : > { %v3087_v34 = vpop.f32.mrf.mxu1 }
 0x1d4   : > { %3692 = vxpose.xlu0.b32.cont [4/16] (narrow) %v3660_v21, 8  ;;  %v6578_v50 = vpop.f32.mrf.mxu0  ;;  %v3206_v17 = vadd.f32 %v3087_v34, %v6492_v7  ;;  %v3633_v18 = vadd.f32 %v6562_v33, %v3594_v57 }
 0x1d5   : > { %v6576_v3 = vpop.f32.mrf.mxu1 }
 0x1d6   : > { %v6582_v12 = vpop.f32.mrf.mxu0  ;;  %v3596_v36 = vadd.f32 %v3477_v56, %v3206_v17  ;;  %v3209_v1 = vadd.f32 %v6576_v3, %v6495_v61 }
 0x1d7   : > { %v3097_v35 = vpop.f32.mrf.mxu1 }
 0x1d8   : > { %3693 = vxpose.xlu0.b32.cont [5/16] (narrow) %v3661_v20, 8  ;;  %v6588_v29 = vpop.f32.mrf.mxu0  ;;  %v3599_v61 = vadd.f32 %v6578_v50, %v3209_v1 }
 0x1d9   : > { %v6586_v10 = vpop.f32.mrf.mxu1 }
 0x1da   : > { %v6594_v9 = vpop.f32.mrf.mxu0 }
 0x1db   : > { %v6592_v46 = vpop.f32.mrf.mxu1 }
 0x1dc   : > { %3694 = vxpose.xlu0.b32.cont [6/16] (narrow) %v3662_v31, 8  ;;  %v5064_v19 = vpop.f32.mrf.mxu0  ;;  %v3665_v31 = vmax.f32 %v3633_v18, 0.0  ;;  %v3210_v3 = vadd.f32 %v6592_v46, %v6504_v5 }
 0x1dd   : > { %v5014_v16 = vpop.f32.mrf.mxu1 }
 0x1de   : > { %v3213_v14 = vadd.f32 %v5014_v16, %v6511_v58  ;;  %v3507_v49 = vpop.f32.mrf.mxu0  ;;  %v3207_v58 = vadd.f32 %v5005_v53, %v6489_v45  ;;  %v3666_v16 = vmax.f32 %v3634_v24, 0.0 }
 0x1df   : > { %v3117_v54 = vpop.f32.mrf.mxu1 }
 0x1e0   : > { %v3212_v59 = vadd.f32 %v3117_v54, %v2822_v27  ;;  %3695 = vxpose.xlu0.b32.cont [7/16] (narrow) %v3663_v52, 8  ;;  %v5067_v21 = vpop.f32.mrf.mxu0  ;;  %v3603_v42 = vadd.f32 %v5064_v19, %v3213_v14  ;;  %v3597_v45 = vadd.f32 %v6572_v62, %v3207_v58  ;;  %v3635_v52 = vadd.f32 %v6562_v33, %v3596_v36 }
 0x1e1   : > { %v5017_v23 = vpop.f32.mrf.mxu1 }
 0x1e2   : > { %v3602_v4 = vadd.f32 %v3507_v49, %v3212_v59  ;;  %v3517_v43 = vpop.f32.mrf.mxu0  ;;  %v3215_v28 = vadd.f32 %v5017_v23, %v6514_v48  ;;  %v3642_v37 = vadd.f32 %v6562_v33, %v3603_v42  ;;  %v3667_v42 = vmax.f32 %v3635_v52, 0.0 }
 0x1e3   : > { %v3127_v0 = vpop.f32.mrf.mxu1 }
 0x1e4   : > { %v3214_v63 = vadd.f32 %v3127_v0, %v6517_v51  ;;  %3696 = vxpose.xlu0.b32.cont [8/16] (narrow) %v3664_v26, 8  ;;  %v3641_v20 = vadd.f32 %v6562_v33, %v3602_v4  ;;  %v5070_v34 = vpop.f32.mrf.mxu0  ;;  %v3208_v51 = vadd.f32 %v3097_v35, %v6498_v6  ;;  %v3605_v53 = vadd.f32 %v5067_v21, %v3215_v28 }
 0x1e5   : > { %v5020_v7 = vpop.f32.mrf.mxu1  ;;  %v3674_v57 = vmax.f32 %v3642_v37, 0.0  ;;  %v3636_v6 = vadd.f32 %v6562_v33, %v3597_v45  ;;  %v3600_v28 = vadd.f32 %v6594_v9, %v3210_v3 }
 0x1e6   : > { %v3604_v40 = vadd.f32 %v3517_v43, %v3214_v63  ;;  %v3673_v30 = vmax.f32 %v3641_v20, 0.0  ;;  %v3527_v55 = vpop.f32.mrf.mxu0  ;;  %v3598_v35 = vadd.f32 %v6582_v12, %v3208_v51  ;;  %v3217_v49 = vadd.f32 %v5020_v7, %v6520_v15 }
 0x1e7   : > { %v3137_v27 = vpop.f32.mrf.mxu1  ;;  %v3644_v25 = vadd.f32 %v6562_v33, %v3605_v53  ;;  %v3668_v15 = vmax.f32 %v3636_v6, 0.0 }
 0x1e8   : > { %3721 = vxpose.xlu1.b32.start [1/16] (narrow) %v3673_v30, 8  ;;  %3697 = vxpose.xlu0.b32.cont [9/16] (narrow) %v3665_v31, 8  ;;  %v6610_v48 = vpop.f32.mrf.mxu0  ;;  %v3216_v19 = vadd.f32 %v3137_v27, %v6523_v41  ;;  %v3643_v14 = vadd.f32 %v6562_v33, %v3604_v40  ;;  %v3607_v0 = vadd.f32 %v5070_v34, %v3217_v49 }
 0x1e9   : > { %v5023_v56 = vpop.f32.mrf.mxu1  ;;  %v3676_v63 = vmax.f32 %v3644_v25, 0.0  ;;  %v3637_v20 = vadd.f32 %v6562_v33, %v3598_v35 }
 0x1ea   : > { %v3537_v54 = vpop.f32.mrf.mxu0  ;;  %v3606_v17 = vadd.f32 %v3527_v55, %v3216_v19  ;;  %v3675_v21 = vmax.f32 %v3643_v14, 0.0  ;;  %v3219_v30 = vadd.f32 %v5023_v56, %v6526_v22 }
 0x1eb   : > { %v3147_v62 = vpop.f32.mrf.mxu1  ;;  %v3669_v55 = vmax.f32 %v3637_v20, 0.0 }
 0x1ec   : > { %3722 = vxpose.xlu1.b32.cont [2/16] (narrow) %v3674_v57, 8  ;;  %3698 = vxpose.xlu0.b32.cont [10/16] (narrow) %v3666_v16, 8  ;;  %v5076_v41 = vpop.f32.mrf.mxu0  ;;  %v3218_v43 = vadd.f32 %v3147_v62, %v6529_v13  ;;  %v3645_v5 = vadd.f32 %v6562_v33, %v3606_v17  ;;  %v3638_v13 = vadd.f32 %v6562_v33, %v3599_v61 }
 0x1ed   : > { %v5026_v59 = vpop.f32.mrf.mxu1  ;;  %v3609_v56 = vadd.f32 %v6610_v48, %v3219_v30  ;;  %v3639_v62 = vadd.f32 %v6562_v33, %v3600_v28 }
 0x1ee   : > { %v3221_v23 = vadd.f32 %v5026_v59, %v6532_v39  ;;  %v3547_v26 = vpop.f32.mrf.mxu0  ;;  %v3608_v31 = vadd.f32 %v3537_v54, %v3218_v43  ;;  %v3677_v45 = vmax.f32 %v3645_v5, 0.0  ;;  %v3670_v1 = vmax.f32 %v3638_v13, 0.0 }
 0x1ef   : > { %v3157_v4 = vpop.f32.mrf.mxu1  ;;  %v3671_v25 = vmax.f32 %v3639_v62, 0.0 }
 0x1f0   : > { %v3220_v12 = vadd.f32 %v3157_v4, %v6535_v2  ;;  %v3611_v18 = vadd.f32 %v5076_v41, %v3221_v23  ;;  %3723 = vxpose.xlu1.b32.cont [3/16] (narrow) %v3675_v21, 8  ;;  %3699 = vxpose.xlu0.b32.cont [11/16] (narrow) %v3667_v42, 8  ;;  %v5079_v39 = vpop.f32.mrf.mxu0  ;;  %v3211_v2 = vadd.f32 %v6586_v10, %v6501_v60 }
 0x1f1   : > { %v5029_v58 = vpop.f32.mrf.mxu1  ;;  %v3646_v60 = vadd.f32 %v6562_v33, %v3607_v0  ;;  %v3647_v6 = vadd.f32 %v6562_v33, %v3608_v31 }
 0x1f2   : > { %v3223_v50 = vadd.f32 %v5029_v58, %v6538_v11  ;;  %v3610_v36 = vadd.f32 %v3547_v26, %v3220_v12  ;;  %v3650_v46 = vadd.f32 %v6562_v33, %v3611_v18  ;;  %v3557_v34 = vpop.f32.mrf.mxu0 }
 0x1f3   : > { %v3167_v7 = vpop.f32.mrf.mxu1  ;;  %v3679_v21 = vmax.f32 %v3647_v6, 0.0 }
 0x1f4   : > { %v3222_v24 = vadd.f32 %v3167_v7, %v6541_v38  ;;  %v3613_v40 = vadd.f32 %v5079_v39, %v3223_v50  ;;  %3724 = vxpose.xlu1.b32.cont [4/16] (narrow) %v3676_v63, 8  ;;  %3700 = vxpose.xlu0.b32.cont [12/16] (narrow) %v3668_v15, 8  ;;  %v3649_v11 = vadd.f32 %v6562_v33, %v3610_v36  ;;  %v5082_v27 = vpop.f32.mrf.mxu0  ;;  %v3682_v26 = vmax.f32 %v3650_v46, 0.0 }
 0x1f5   : > { %v5032_v37 = vpop.f32.mrf.mxu1  ;;  %v3601_v38 = vadd.f32 %v6588_v29, %v3211_v2 }
 0x1f6   : > { %v3225_v10 = vadd.f32 %v5032_v37, %v6544_v44  ;;  %v3612_v9 = vadd.f32 %v3557_v34, %v3222_v24  ;;  %v3652_v51 = vadd.f32 %v6562_v33, %v3613_v40  ;;  %v3567_v16 = vpop.f32.mrf.mxu0  ;;  %v3678_v44 = vmax.f32 %v3646_v60, 0.0 }
 0x1f7   : > { %v3177_v53 = vpop.f32.mrf.mxu1  ;;  %v3640_v17 = vadd.f32 %v6562_v33, %v3601_v38  ;;  %v3681_v4 = vmax.f32 %v3649_v11, 0.0 }
 0x1f8   : > { %v3224_v19 = vadd.f32 %v3177_v53, %v6549_v8  ;;  %v3615_v57 = vadd.f32 %v5082_v27, %v3225_v10  ;;  %3725 = vxpose.xlu1.b32.cont [5/16] (narrow) %v3677_v45, 8  ;;  %3701 = vxpose.xlu0.b32.cont [13/16] (narrow) %v3669_v55, 8  ;;  %v3651_v22 = vadd.f32 %v6562_v33, %v3612_v9  ;;  %v5085_v52 = vpop.f32.mrf.mxu0  ;;  %v3684_v18 = vmax.f32 %v3652_v51, 0.0 }
 0x1f9   : > { %v5035_v14 = vpop.f32.mrf.mxu1 }
 0x1fa   : > { %v3227_v54 = vadd.f32 %v5035_v14, %v6552_v47  ;;  %v3614_v29 = vadd.f32 %v3567_v16, %v3224_v19  ;;  %v3654_v8 = vadd.f32 %v6562_v33, %v3615_v57  ;;  %v3577_v49 = vpop.f32.mrf.mxu0  ;;  %v3648_v47 = vadd.f32 %v6562_v33, %v3609_v56 }
 0x1fb   : > { %v3187_v35 = vpop.f32.mrf.mxu1  ;;  %v3683_v12 = vmax.f32 %v3651_v22, 0.0 }
 0x1fc   : > { %v3226_v59 = vadd.f32 %v3187_v35, %v6556_v32  ;;  %v3617_v41 = vadd.f32 %v5085_v52, %v3227_v54  ;;  %3726 = vxpose.xlu1.b32.cont [6/16] (narrow) %v3678_v44, 8  ;;  %3702 = vxpose.xlu0.b32.cont [14/16] (narrow) %v3670_v1, 8  ;;  %v3653_v48 = vadd.f32 %v6562_v33, %v3614_v29  ;;  %v3680_v3 = vmax.f32 %v3648_v47, 0.0 }
 0x1fd   : > { %v3672_v32 = vmax.f32 %v3640_v17, 0.0  ;;  %v3686_v0 = vmax.f32 %v3654_v8, 0.0 }
 0x1fe   : > { %v3616_v23 = vadd.f32 %v3577_v49, %v3226_v59  ;;  %v3656_v42 = vadd.f32 %v6562_v33, %v3617_v41  ;;  %v3685_v15 = vmax.f32 %v3653_v48, 0.0 }
 0x200   : > { %3727 = vxpose.xlu1.b32.cont [7/16] (narrow) %v3679_v21, 8  ;;  %3703 = vxpose.xlu0.b32.cont [15/16] (narrow) %v3671_v25, 8  ;;  %v3655_v61 = vadd.f32 %v6562_v33, %v3616_v23  ;;  %v3688_v33 = vmax.f32 %v3656_v42, 0.0 }
 0x202   : > { %v3687_v43 = vmax.f32 %v3655_v61, 0.0 }
 0x204   : > { %3728 = vxpose.xlu1.b32.cont [8/16] (narrow) %v3680_v3, 8  ;;  %3704 = vxpose.xlu0.b32.end [16/16] (narrow) %v3672_v32, 8 }
 0x208   : > { %3729 = vxpose.xlu1.b32.cont [9/16] (narrow) %v3681_v4, 8 }
 0x20c   : > { %3730 = vxpose.xlu1.b32.cont [10/16] (narrow) %v3682_v26, 8 }
 0x210   : > { %3731 = vxpose.xlu1.b32.cont [11/16] (narrow) %v3683_v12, 8 }
 0x214   : > { %3732 = vxpose.xlu1.b32.cont [12/16] (narrow) %v3684_v18, 8 }
 0x218   : > { %3733 = vxpose.xlu1.b32.cont [13/16] (narrow) %v3685_v15, 8 }
 0x21c   : > { %3734 = vxpose.xlu1.b32.cont [14/16] (narrow) %v3686_v0, 8 }
 0x220   : > { %3735 = vxpose.xlu1.b32.cont [15/16] (narrow) %v3687_v43, 8 }
 0x224   : > { %3736 = vxpose.xlu1.b32.end [16/16] (narrow) %v3688_v33, 8 }
 0x244   : > { %v3705_v58 = vpop.trf.xlu0 }
 0x245   : > { %3753 = vst [vmem:[%s163_s6] sm:$0xff] %v3705_v58 }
 0x264   : > { %v3737_v39 = vpop.trf.xlu1 }
 0x265   : > { %3754 = vst [vmem:[%s163_s6 + $0x8] sm:$0xff] %v3737_v39 }
 0x266   : > { %5141 = shalt.err (!%p5138_p3)
}
 0x267   : > { %s5142_s25 = scalar_lea.hbm %s3768_s11, 256  ;;  %s5146_s28 = scalar_lea.hbm %s6698_s3, 512 }
 0x268   : > { %p5143_p4 = scmp.ne.s32.totalorder %s3768_s11, %s5142_s25  ;;  %p5147_p9 = scmp.lt.s32.totalorder %s3768_s11, %s6698_s3 }
 0x269   : > { %p5148_p10 = scmp.lt.s32.totalorder %s5146_s28, %s5142_s25 }
 0x26a   : > { %p5144_p7 = pnand %p5143_p4, %p5249_p5 }
 0x26b   : > { %p5149_p11 = por %p5148_p10, %p5147_p9 }
 0x26c   : > { %p5145_p8 = pneg %p5144_p7 }
 0x26e   : > { %p5150_p12 = pnand %p5149_p11, %p5145_p8 }
 0x270   : > { %5153 = shalt.err (!%p5150_p12)
}
 0x271   : > { %5089 = dma.vmem_to_hbm [thread:$0]  (%p5249_p5), %s6657_s7, 256, %s3768_s11, %s3756_s17  }
 0x272 PF: > { %p5095_p13 = scmp.ge.s32.totalorder %s5188_s15, 2  ;;  %s3782_s4 = sand.u32 1, %s5176_s12  }
 0x273   : > { %s3783_s5 = scalar_lea.sflag [#allocation3], %s3782_s4 }
 0x274   : > { %p5092_p0 = pnand %p5095_p13, %p5253_p6 }
 0x276   : > { %p5093_p1 = pneg %p5092_p0 }
 0x278   : > { %5171 = dma.done.wait (%p5093_p1), %s3783_s5, 256  }
 0x279   : > { %5173 = vsyncadd (%p5093_p1), %s3783_s5, 4294967040  ;;  %p13_p2 = scmp.ge.s32.totalorder %s5236_s18, 4   ;;  %s6841_s12 = smov %s5180_s13 }
 0x27a   : > { %s6842_s13 = smov %s5184_s14  ;;  %s6843_s14 = smov %s5247_s21 }
 0x27b   : > { %s6844_s15 = smov %s5236_s18  ;;  %15 = sbr.rel (!%p13_p2) target bundleno = 3 (0x3), region = 77 }
 0x280   :  { %3788 = vsyncpa [#allocation3], 1 }
 0x281   :  { %3790 = vsyncpa [#allocation3 + $0x1], 1 }

</bundles_post_ra>
